<compile_context>
chip_gen: v7x
topology: tpu7x:2x2x1
jax: 0.10.0
libtpu: 0.0.40
codegen_flags: <defaults>
</compile_context>

<pallas_src>
import functools

import jax
import jax.numpy as jnp
from jax import lax
from jax.experimental import pallas as pl
from jax.experimental.pallas import tpu as pltpu

_MXU_DTYPE = jnp.bfloat16            # MXU operand dtype (accumulation is f32)
_HEAD_ORDER = ("left", "right", "fuse", "body")
_LOSS_ORDER = ("fuse", "left", "right", "body")
_NEG_INF = -1e30


def _round_up(x, m):
    return (x + m - 1) // m * m


def _vmem_limit_bytes():
    """Per-generation VMEM limit: 3/4 of physical capacity (96 MiB on the
    128 MiB v5e/v6e parts, 48 MiB on the 64 MiB v7x part)."""
    cap = 0
    try:
        cap = int(pltpu.get_tpu_info().vmem_capacity_bytes)
    except Exception:
        cap = 0
    if cap <= 0:
        cap = 64 * 1024 * 1024       # conservative fallback (v7x-class part)
    return (cap * 3) // 4


def _choose_row_tile(BT, per_tile_row_bytes, weight_bytes, budget):
    """Largest row tile that (a) fits the VMEM budget, (b) keeps >=2 grid
    steps when possible (so v7x's two TensorCores both get work on the
    'parallel' axis), (c) minimizes padded/wasted rows."""
    candidates = (1024, 512, 384, 256, 128, 64, 32, 16)
    feasible = [tm for tm in candidates
                if weight_bytes + tm * per_tile_row_bytes <= budget]
    if not feasible:
        # TODO(synk): if V/H ever grow enough that even TM=16 overflows VMEM,
        # add a second grid axis over the 4 heads and stream W2 per head.
        feasible = [16]

    def score(tm):
        bt_pad = _round_up(max(BT, tm), tm)
        n_tiles = bt_pad // tm
        waste = bt_pad - BT
        return (0 if n_tiles >= 2 else 1, waste, -tm)

    return min(feasible, key=score)


# ----------------------------------------------------------------------------
# Fused Pallas kernel: 3 keypoint encoders + 4 visual heads + ensemble.
# Grid axis 0 tiles rows of B*T and is "parallel" (megacore / v7x 2-TC shard).
# Weight slabs are resident in VMEM; outputs are lane-dense (padded to 128).
# ----------------------------------------------------------------------------
def _scatt_fused_kernel(x_ref, m_ref, we_ref, be_ref, w1_ref, b1_ref,
                        w2_ref, b2_ref, emb_ref, lp_ref, prob_ref, ens_ref,
                        *, Hp, Vp):
    # --- keypoint encoders (fused): emb columns = [left | right | body | pad]
    emb = jnp.dot(x_ref[...], we_ref[...], preferred_element_type=jnp.float32)
    emb = jnp.maximum(emb + be_ref[...], 0.0) * m_ref[...]       # frame mask
    emb_bf = emb.astype(_MXU_DTYPE)
    emb_ref[...] = emb_bf                                        # 'fuse' (bf16)

    # --- visual heads, layer 1: one wide matmul for all four heads ---
    h = jnp.dot(emb_bf, w1_ref[...], preferred_element_type=jnp.float32)
    h = jnp.maximum(h + b1_ref[...], 0.0)

    # --- per-head layer 2 + softmax; ensemble = log(sum of per-head probs) ---
    n_heads = lp_ref.shape[1] // Vp
    ens = None
    for i in range(n_heads):                       # static unroll (4 heads)
        hi = h[:, i * Hp:(i + 1) * Hp].astype(_MXU_DTYPE)
        logits = jnp.dot(hi, w2_ref[i], preferred_element_type=jnp.float32)
        logits = logits + b2_ref[i]                # padded classes bias = -1e30
        mx = jnp.max(logits, axis=-1, keepdims=True)
        z = logits - mx
        e = jnp.exp(z)
        s = jnp.sum(e, axis=-1, keepdims=True)
        logp = z - jnp.log(s)                      # exact log_softmax (-> CTC)
        p = e / s                                  # exact softmax probs
        lp_ref[:, i * Vp:(i + 1) * Vp] = logp
        prob_ref[:, i * Vp:(i + 1) * Vp] = p       # 'gloss_logits' output
        ens = p if ens is None else ens + p
    ens_ref[...] = jnp.log(ens)


# ----------------------------------------------------------------------------
# Parameter packing: embed per-part / per-head weights into padded slabs so the
# fused kernel needs only dense matmuls (no gathers, no concatenates).
# ----------------------------------------------------------------------------
def _pack_params(params, body_idx, left_idx, right_idx, K_total, C, D, H, V):
    F = K_total * C
    Fp = _round_up(F, 128)
    Ep = _round_up(3 * D, 128)
    Hp = _round_up(H, 128)
    Vp = _round_up(V, 128)

    coord = jnp.arange(C, dtype=jnp.int32)

    def flat_rows(idx):
        idx = jnp.asarray(idx, jnp.int32)
        return (idx[:, None] * C + coord[None, :]).reshape(-1)

    part_off = {"left": 0, "right": D, "body": 2 * D}
    part_idx = {"left": left_idx, "right": right_idx, "body": body_idx}

    # Encoder: combined weight (Fp, Ep); emb columns [left | right | body | 0].
    We = jnp.zeros((Fp, Ep), jnp.float32)
    be = jnp.zeros((1, Ep), jnp.float32)
    for pname in ("left", "right", "body"):
        w, b = params[f"{pname}_encoder"]
        rows = flat_rows(part_idx[pname])
        o = part_off[pname]
        We = We.at[rows, o:o + D].set(w)
        be = be.at[:, o:o + D].set(b)

    # Heads layer 1: combined weight (Ep, 4*Hp); one Hp-wide block per head.
    head_parts = {"left": ("left", "body"), "right": ("right", "body"),
                  "fuse": ("left", "right", "body"), "body": ("body",)}
    W1 = jnp.zeros((Ep, 4 * Hp), jnp.float32)
    b1 = jnp.zeros((1, 4 * Hp), jnp.float32)
    # Heads layer 2: stacked (4, Hp, Vp); padded classes get bias -1e30.
    W2 = jnp.zeros((4, Hp, Vp), jnp.float32)
    b2 = jnp.full((4, 1, Vp), _NEG_INF, jnp.float32)
    for hi, hname in enumerate(_HEAD_ORDER):
        w1_h, b1_h, w2_h, b2_h = params[f"{hname}_head"]
        c0 = hi * Hp
        for pi, pname in enumerate(head_parts[hname]):
            o = part_off[pname]
            W1 = W1.at[o:o + D, c0:c0 + H].set(w1_h[pi * D:(pi + 1) * D])
        b1 = b1.at[:, c0:c0 + H].set(b1_h)
        W2 = W2.at[hi, :H, :V].set(w2_h)
        b2 = b2.at[hi, :, :V].set(b2_h)

    return (We, be, W1, b1, W2, b2), (Fp, Ep, Hp, Vp)


def _fused_call(keypoints, mask, packed, dims, D, V, buffered_weights):
    We, be, W1, b1, W2, b2 = packed
    Fp, Ep, Hp, Vp = dims
    B, T, K, C = keypoints.shape
    BT = B * T
    F = K * C

    vmem_limit = _vmem_limit_bytes()
    # VMEM accounting for adaptive TM: resident weights (single- or
    # double-buffered), double-buffered row-tile I/O, in-kernel temporaries.
    wfac = 1 if buffered_weights else 2
    weight_bytes = wfac * (Fp * Ep * 2 + Ep * 4 + Ep * (4 * Hp) * 2
                           + 4 * Hp * 4 + 4 * Hp * Vp * 2 + 4 * Vp * 4)
    per_row_io = (Fp * 2 + 4) + (Ep * 2 + 4 * Vp * 4 + 4 * Vp * 4 + Vp * 4)
    per_row_tmp = Ep * 4 + 4 * Hp * 4 + 3 * Vp * 4
    TM = _choose_row_tile(BT, 2 * per_row_io + per_row_tmp, weight_bytes,
                          int(vmem_limit * 0.85))
    BT_pad = _round_up(max(BT, TM), TM)

    # Stage the input directly in bf16 (single padded slab, no extra f32 copy).
    # TODO(synk): assumes keypoint coords are roughly normalized; keep the
    # encoder matmul in f32 if raw pixel coords make bf16 rounding visible.
    x = jnp.pad(keypoints.reshape(BT, F).astype(_MXU_DTYPE),
                ((0, BT_pad - BT), (0, Fp - F)))
    m = jnp.pad(mask.reshape(BT, 1).astype(jnp.float32),
                ((0, BT_pad - BT), (0, 0)))

    def w_spec(shape, imap):
        # Grid-invariant weight blocks: single-buffered (no pipelining gain,
        # halves resident-weight VMEM on the 64 MiB v7x part).
        if buffered_weights:
            return pl.BlockSpec(shape, imap, pipeline_mode=pl.Buffered(1))
        return pl.BlockSpec(shape, imap)

    kernel = functools.partial(_scatt_fused_kernel, Hp=Hp, Vp=Vp)
    emb, lp, probs, ens = pl.pallas_call(
        kernel,
        out_shape=(
            jax.ShapeDtypeStruct((BT_pad, Ep), _MXU_DTYPE),       # embeddings (bf16)
            jax.ShapeDtypeStruct((BT_pad, 4 * Vp), jnp.float32),  # 4x log-probs
            jax.ShapeDtypeStruct((BT_pad, 4 * Vp), jnp.float32),  # 4x softmax probs
            jax.ShapeDtypeStruct((BT_pad, Vp), jnp.float32),      # ensemble log-sum
        ),
        grid=(BT_pad // TM,),
        in_specs=[
            pl.BlockSpec((TM, Fp), lambda i: (i, 0)),        # keypoints tile
            pl.BlockSpec((TM, 1), lambda i: (i, 0)),         # frame mask tile
            w_spec((Fp, Ep), lambda i: (0, 0)),              # encoder W (resident)
            w_spec((1, Ep), lambda i: (0, 0)),
            w_spec((Ep, 4 * Hp), lambda i: (0, 0)),          # heads W1 (resident)
            w_spec((1, 4 * Hp), lambda i: (0, 0)),
            w_spec((4, Hp, Vp), lambda i: (0, 0, 0)),        # heads W2 (resident)
            w_spec((4, 1, Vp), lambda i: (0, 0, 0)),
        ],
        out_specs=(
            pl.BlockSpec((TM, Ep), lambda i: (i, 0)),
            pl.BlockSpec((TM, 4 * Vp), lambda i: (i, 0)),
            pl.BlockSpec((TM, 4 * Vp), lambda i: (i, 0)),
            pl.BlockSpec((TM, Vp), lambda i: (i, 0)),
        ),
        compiler_params=pltpu.CompilerParams(
            dimension_semantics=("parallel",),
            vmem_limit_bytes=int(vmem_limit),
        ),
    )(x, m, We.astype(_MXU_DTYPE), be,
      W1.astype(_MXU_DTYPE), b1, W2.astype(_MXU_DTYPE), b2)

    fuse_output = emb[:BT, :3 * D].astype(jnp.float32).reshape(B, T, 3 * D)
    ens_logits = ens[:BT, :V].reshape(B, T, V)
    head_logp = {n: lp[:BT, i * Vp:i * Vp + V].reshape(B, T, V)
                 for i, n in enumerate(_HEAD_ORDER)}
    head_prob = {n: probs[:BT, i * Vp:i * Vp + V].reshape(B, T, V)
                 for i, n in enumerate(_HEAD_ORDER)}
    return fuse_output, head_logp, head_prob, ens_logits


# ----------------------------------------------------------------------------
# CTC loss (plain JAX glue).
# TODO(synk): the CTC forward DP has no clean rectangular-tile Pallas mapping;
#             kept as a lax.scan in plain JAX (vmapped over heads x batch).
# ----------------------------------------------------------------------------
def _ctc_single(log_probs, labels, input_len, label_len, blank=0):
    T, V = log_probs.shape
    L = labels.shape[0]
    S = 2 * L + 1
    idx = jnp.arange(S)
    ext = jnp.where(idx % 2 == 0, blank, labels[jnp.minimum(idx // 2, L - 1)])
    ext_m2 = jnp.concatenate([jnp.array([blank, blank], dtype=ext.dtype), ext[:-2]])
    allow_skip = (idx >= 2) & (ext != blank) & (ext != ext_m2)

    alpha = jnp.full((S,), _NEG_INF, dtype=jnp.float32)
    alpha = alpha.at[0].set(log_probs[0, blank])
    if S > 1:
        alpha = alpha.at[1].set(
            jnp.where(label_len > 0, log_probs[0, ext[1]], _NEG_INF))

    def step(a_prev, inp):
        t, lp_t = inp
        a1 = jnp.concatenate([jnp.array([_NEG_INF], dtype=a_prev.dtype), a_prev[:-1]])
        a2 = jnp.concatenate(
            [jnp.array([_NEG_INF, _NEG_INF], dtype=a_prev.dtype), a_prev[:-2]])
        a2 = jnp.where(allow_skip, a2, _NEG_INF)
        new = jnp.logaddexp(jnp.logaddexp(a_prev, a1), a2) + lp_t[ext]
        new = jnp.where(t < input_len, new, a_prev)
        return new, None

    ts = jnp.arange(1, T)
    alpha_f, _ = lax.scan(step, alpha, (ts, log_probs[1:]))

    end1 = 2 * label_len
    end2 = jnp.maximum(2 * label_len - 1, 0)
    ll = jnp.logaddexp(alpha_f[end1],
                       jnp.where(label_len > 0, alpha_f[end2], _NEG_INF))
    loss = -ll
    return jnp.where(loss > 1e29, 0.0, loss)        # zero_infinity=True


# ----------------------------------------------------------------------------
# Model: parameters + forward
# ----------------------------------------------------------------------------
def init_params(key, cfg, vocab):
    D = cfg["embed_dim"]
    H = cfg["hidden_dim"]
    Cc = cfg["coord_dim"]
    ks = iter(jax.random.split(key, 32))

    def linear(fan_in, fan_out):
        w = 0.1 * jax.random.normal(next(ks), (fan_in, fan_out), jnp.float32)
        b = 0.01 * jax.random.normal(next(ks), (1, fan_out), jnp.float32)
        return w, b

    params = {}
    for name, idx in (("body", cfg["body_idx"]), ("left", cfg["left_idx"]),
                      ("right", cfg["right_idx"])):
        params[f"{name}_encoder"] = linear(len(idx) * Cc, D)

    def head(din):
        w1, b1 = linear(din, H)
        w2, b2 = linear(H, vocab)
        return (w1, b1, w2, b2)

    params["left_head"] = head(2 * D)    # input cat([left, body])
    params["right_head"] = head(2 * D)   # input cat([right, body])
    params["fuse_head"] = head(3 * D)    # input cat([left, right, body])
    params["body_head"] = head(D)
    return params


@functools.partial(jax.jit, static_argnames=("cfg_static", "buffered_weights"))
def _forward_impl(params, keypoints, mask, mask_head, valid_len_in,
                  gloss_labels, gloss_lengths, cfg_static, buffered_weights):
    body_idx, left_idx, right_idx = cfg_static
    B, T, K_total, C = keypoints.shape
    D = params["body_encoder"][0].shape[1]
    H = params["body_head"][0].shape[1]
    V = params["body_head"][2].shape[1]

    packed, dims = _pack_params(params, body_idx, left_idx, right_idx,
                                K_total, C, D, H, V)

    # TODO(synk): mask_head is accepted but unused (VisualHead source not
    # provided); frame masking is applied at the encoder output instead.
    fuse_output, head_logp, head_prob, ens_logits = _fused_call(
        keypoints, mask, packed, dims, D, V, buffered_weights)

    outputs = {
        "ensemble_last_gloss_logits": ens_logits,
        "fuse": fuse_output,
        "input_lengths": valid_len_in,
    }
    for name in _HEAD_ORDER:
        outputs[f"{name}_gloss_prob_log"] = head_logp[name]
        outputs[f"{name}_gloss_logits"] = head_prob[name]    # softmax probs (kernel)

    # All four CTC losses in one double-vmapped program (heads x batch).
    stacked = jnp.stack([head_logp[k] for k in _LOSS_ORDER], axis=0)
    per_head_per_ex = jax.vmap(
        jax.vmap(_ctc_single, in_axes=(0, 0, 0, 0)),
        in_axes=(0, None, None, None))(stacked, gloss_labels,
                                       valid_len_in, gloss_lengths)
    # nn.CTCLoss(reduction='sum') then / batch size
    losses = jnp.sum(per_head_per_ex, axis=1) / B
    for i, k in enumerate(_LOSS_ORDER):
        outputs[f"{k}_loss"] = losses[i]
    outputs["total_loss"] = jnp.sum(losses)
    # self_distillation branch intentionally disabled (reference reads a key
    # that is never produced and would raise).
    return outputs


def sc_attent_net_forward(params, cfg, src_input):
    cfg_static = (tuple(cfg["body_idx"]), tuple(cfg["left_idx"]),
                  tuple(cfg["right_idx"]))
    args = (params, src_input["keypoints"], src_input["mask"],
            src_input["mask_head"], src_input["valid_len_in"],
            src_input["gloss_labels"], src_input["gloss_lengths"])
    try:
        return _forward_impl(*args, cfg_static=cfg_static, buffered_weights=True)
    except Exception:
        # TODO(synk): pl.Buffered(1) (single-buffered resident weights) not
        # accepted by this jax/libtpu build; fall back to default buffering.
        return _forward_impl(*args, cfg_static=cfg_static, buffered_weights=False)


# ----------------------------------------------------------------------------
if __name__ == "__main__":
    B, T, K_total, Cc = 2, 8, 16, 3
    cfg = {
        "body_idx": list(range(0, 6)),
        "left_idx": list(range(6, 11)),
        "right_idx": list(range(11, 16)),
        "num_frame": T,
        "embed_dim": 32,
        "hidden_dim": 64,
        "coord_dim": Cc,
        "self_distillation": False,
    }
    vocab = 16  # len(gloss_tokenizer)

    params = init_params(jax.random.PRNGKey(42), cfg, vocab)

    key = jax.random.PRNGKey(0)
    k_kp, k_lab = jax.random.split(key)
    keypoints = jax.random.normal(k_kp, (B, T, K_total, Cc), jnp.float32)
    valid_len_in = jnp.array([8, 6], dtype=jnp.int32)
    frame_ids = jnp.arange(T)[None, :]
    mask = (frame_ids < valid_len_in[:, None]).astype(jnp.float32)      # [B, T]
    mask_head = mask
    Lmax = 4
    gloss_labels = jax.random.randint(k_lab, (B, Lmax), 1, vocab).astype(jnp.int32)
    gloss_lengths = jnp.array([3, 2], dtype=jnp.int32)

    src_input = {
        "keypoints": keypoints,
        "mask": mask,
        "mask_head": mask_head,
        "valid_len_in": valid_len_in,
        "gloss_labels": gloss_labels,
        "gloss_lengths": gloss_lengths,
    }

    out = sc_attent_net_forward(params, cfg, src_input)
    jax.block_until_ready(out["total_loss"])

    assert out["fuse_gloss_logits"].shape == (B, T, vocab)
    assert out["ensemble_last_gloss_logits"].shape == (B, T, vocab)
    assert out["fuse"].shape == (B, T, 3 * cfg["embed_dim"])
    # kernel-emitted softmax probs must agree with exp(log_softmax)
    assert bool(jnp.allclose(jnp.exp(out["fuse_gloss_prob_log"]),
                             out["fuse_gloss_logits"], atol=1e-4))
    assert bool(jnp.isfinite(out["total_loss"]))
    print("KERNEL_OK")
</pallas_src>

<mosaic_0001>
module attributes {stable_mosaic.version = 11 : i64} {
  func.func @_scatt_fused_kernel(%arg0: i32, %arg1: memref<16x128xbf16, #tpu.memory_space<vmem>>, %arg2: memref<16x1xf32, #tpu.memory_space<vmem>>, %arg3: memref<128x128xbf16, #tpu.memory_space<vmem>>, %arg4: memref<1x128xf32, #tpu.memory_space<vmem>>, %arg5: memref<128x512xbf16, #tpu.memory_space<vmem>>, %arg6: memref<1x512xf32, #tpu.memory_space<vmem>>, %arg7: memref<4x128x128xbf16, #tpu.memory_space<vmem>>, %arg8: memref<4x1x128xf32, #tpu.memory_space<vmem>>, %arg9: memref<16x128xbf16, #tpu.memory_space<vmem>>, %arg10: memref<16x512xf32, #tpu.memory_space<vmem>>, %arg11: memref<16x512xf32, #tpu.memory_space<vmem>>, %arg12: memref<16x128xf32, #tpu.memory_space<vmem>>) attributes {dimension_semantics = [#tpu.dimension_semantics<parallel>], iteration_bounds = array<i64: 1>, scalar_prefetch = 0 : i64, scratch_operands = 0 : i64, tpu.core_type = #tpu.core_type<tc>, window_params = [{transform_indices = @transform_0, window_bounds = array<i64: 16, 128>}, {transform_indices = @transform_1, window_bounds = array<i64: 16, 1>}, {pipeline_mode = #tpu.pipeline_mode<synchronous>, transform_indices = @transform_2, window_bounds = array<i64: 128, 128>}, {pipeline_mode = #tpu.pipeline_mode<synchronous>, transform_indices = @transform_3, window_bounds = array<i64: 1, 128>}, {pipeline_mode = #tpu.pipeline_mode<synchronous>, transform_indices = @transform_4, window_bounds = array<i64: 128, 512>}, {pipeline_mode = #tpu.pipeline_mode<synchronous>, transform_indices = @transform_5, window_bounds = array<i64: 1, 512>}, {pipeline_mode = #tpu.pipeline_mode<synchronous>, transform_indices = @transform_6, window_bounds = array<i64: 4, 128, 128>}, {pipeline_mode = #tpu.pipeline_mode<synchronous>, transform_indices = @transform_7, window_bounds = array<i64: 4, 1, 128>}, {transform_indices = @transform_8, window_bounds = array<i64: 16, 128>}, {transform_indices = @transform_9, window_bounds = array<i64: 16, 512>}, {transform_indices = @transform_10, window_bounds = array<i64: 16, 512>}, {transform_indices = @transform_11, window_bounds = array<i64: 16, 128>}]} {
    %c0 = arith.constant 0 : index
    %c0_0 = arith.constant 0 : index
    %0 = vector.load %arg1[%c0, %c0_0] : memref<16x128xbf16, #tpu.memory_space<vmem>>, vector<16x128xbf16>
    %c0_1 = arith.constant 0 : index
    %c0_2 = arith.constant 0 : index
    %1 = vector.load %arg3[%c0_1, %c0_2] : memref<128x128xbf16, #tpu.memory_space<vmem>>, vector<128x128xbf16>
    %cst = arith.constant dense<0.000000e+00> : vector<16x128xf32>
    %2 = tpu.matmul %0, %1, %cst {dimension_numbers = #tpu.dot_dimension_numbers<[1], [0], [0], [1], [0, 0, 1, 1], [], []>} : vector<16x128xbf16>, vector<128x128xbf16>, vector<16x128xf32> -> vector<16x128xf32>
    %c0_3 = arith.constant 0 : index
    %c0_4 = arith.constant 0 : index
    %3 = vector.load %arg4[%c0_3, %c0_4] : memref<1x128xf32, #tpu.memory_space<vmem>>, vector<1x128xf32>
    %4 = vector.broadcast %3 : vector<1x128xf32> to vector<16x128xf32>
    %5 = arith.addf %2, %4 : vector<16x128xf32>
    %cst_5 = arith.constant 0.000000e+00 : f32
    %6 = vector.broadcast %cst_5 : f32 to vector<16x128xf32>
    %7 = arith.maximumf %5, %6 : vector<16x128xf32>
    %c0_6 = arith.constant 0 : index
    %c0_7 = arith.constant 0 : index
    %8 = vector.load %arg2[%c0_6, %c0_7] : memref<16x1xf32, #tpu.memory_space<vmem>>, vector<16x1xf32>
    %9 = vector.broadcast %8 : vector<16x1xf32> to vector<16x128xf32>
    %10 = arith.mulf %7, %9 : vector<16x128xf32>
    %11 = arith.truncf %10 : vector<16x128xf32> to vector<16x128xbf16>
    %c0_8 = arith.constant 0 : index
    %c0_9 = arith.constant 0 : index
    %12 = vector.load %arg9[%c0_8, %c0_9] : memref<16x128xbf16, #tpu.memory_space<vmem>>, vector<16x128xbf16>
    tpu.vector_store %arg9[%c0_8, %c0_9], %11 {strides = array<i32>} : memref<16x128xbf16, #tpu.memory_space<vmem>>, vector<16x128xbf16>,
    %c0_10 = arith.constant 0 : index
    %c0_11 = arith.constant 0 : index
    %13 = vector.load %arg5[%c0_10, %c0_11] : memref<128x512xbf16, #tpu.memory_space<vmem>>, vector<128x512xbf16>
    %cst_12 = arith.constant dense<0.000000e+00> : vector<16x512xf32>
    %14 = tpu.matmul %11, %13, %cst_12 {dimension_numbers = #tpu.dot_dimension_numbers<[1], [0], [0], [1], [0, 0, 1, 1], [], []>} : vector<16x128xbf16>, vector<128x512xbf16>, vector<16x512xf32> -> vector<16x512xf32>
    %c0_13 = arith.constant 0 : index
    %c0_14 = arith.constant 0 : index
    %15 = vector.load %arg6[%c0_13, %c0_14] : memref<1x512xf32, #tpu.memory_space<vmem>>, vector<1x512xf32>
    %16 = vector.broadcast %15 : vector<1x512xf32> to vector<16x512xf32>
    %17 = arith.addf %14, %16 : vector<16x512xf32>
    %cst_15 = arith.constant 0.000000e+00 : f32
    %18 = vector.broadcast %cst_15 : f32 to vector<16x512xf32>
    %19 = arith.maximumf %17, %18 : vector<16x512xf32>
    %20 = vector.extract_strided_slice %19 {offsets = [0, 0], sizes = [16, 128], strides = [1, 1]} : vector<16x512xf32> to vector<16x128xf32>
    %21 = arith.truncf %20 : vector<16x128xf32> to vector<16x128xbf16>
    %c0_16 = arith.constant 0 : index
    %c0_17 = arith.constant 0 : index
    %c0_18 = arith.constant 0 : index
    %22 = vector.load %arg7[%c0_16, %c0_17, %c0_18] : memref<4x128x128xbf16, #tpu.memory_space<vmem>>, vector<1x128x128xbf16>
    %23 = vector.shape_cast %22 : vector<1x128x128xbf16> to vector<128x128xbf16>
    %cst_19 = arith.constant dense<0.000000e+00> : vector<16x128xf32>
    %24 = tpu.matmul %21, %23, %cst_19 {dimension_numbers = #tpu.dot_dimension_numbers<[1], [0], [0], [1], [0, 0, 1, 1], [], []>} : vector<16x128xbf16>, vector<128x128xbf16>, vector<16x128xf32> -> vector<16x128xf32>
    %c0_20 = arith.constant 0 : index
    %c0_21 = arith.constant 0 : index
    %c0_22 = arith.constant 0 : index
    %25 = vector.load %arg8[%c0_20, %c0_21, %c0_22] : memref<4x1x128xf32, #tpu.memory_space<vmem>>, vector<1x1x128xf32>
    %26 = vector.shape_cast %25 : vector<1x1x128xf32> to vector<1x128xf32>
    %27 = vector.broadcast %26 : vector<1x128xf32> to vector<16x128xf32>
    %28 = arith.addf %24, %27 : vector<16x128xf32>
    %cst_23 = arith.constant dense<0xFF800000> : vector<16xf32>
    %29 = vector.multi_reduction <maximumf>, %28, %cst_23 [1] : vector<16x128xf32> to vector<16xf32>
    %30 = vector.shape_cast %29 : vector<16xf32> to vector<16x1xf32>
    %31 = vector.broadcast %30 : vector<16x1xf32> to vector<16x128xf32>
    %32 = arith.subf %28, %31 : vector<16x128xf32>
    %33 = math.exp %32 : vector<16x128xf32>
    %cst_24 = arith.constant dense<0.000000e+00> : vector<16xf32>
    %34 = vector.multi_reduction <add>, %33, %cst_24 [1] : vector<16x128xf32> to vector<16xf32>
    %35 = vector.shape_cast %34 : vector<16xf32> to vector<16x1xf32>
    %36 = math.log %35 : vector<16x1xf32>
    %37 = vector.broadcast %36 : vector<16x1xf32> to vector<16x128xf32>
    %38 = arith.subf %32, %37 : vector<16x128xf32>
    %39 = vector.broadcast %35 : vector<16x1xf32> to vector<16x128xf32>
    %40 = arith.divf %33, %39 : vector<16x128xf32>
    %c0_25 = arith.constant 0 : index
    %c0_26 = arith.constant 0 : index
    %41 = vector.load %arg10[%c0_25, %c0_26] : memref<16x512xf32, #tpu.memory_space<vmem>>, vector<16x128xf32>
    tpu.vector_store %arg10[%c0_25, %c0_26], %38 {strides = array<i32>} : memref<16x512xf32, #tpu.memory_space<vmem>>, vector<16x128xf32>,
    %c0_27 = arith.constant 0 : index
    %c0_28 = arith.constant 0 : index
    %42 = vector.load %arg11[%c0_27, %c0_28] : memref<16x512xf32, #tpu.memory_space<vmem>>, vector<16x128xf32>
    tpu.vector_store %arg11[%c0_27, %c0_28], %40 {strides = array<i32>} : memref<16x512xf32, #tpu.memory_space<vmem>>, vector<16x128xf32>,
    %43 = vector.extract_strided_slice %19 {offsets = [0, 128], sizes = [16, 128], strides = [1, 1]} : vector<16x512xf32> to vector<16x128xf32>
    %44 = arith.truncf %43 : vector<16x128xf32> to vector<16x128xbf16>
    %c1 = arith.constant 1 : index
    %c0_29 = arith.constant 0 : index
    %c0_30 = arith.constant 0 : index
    %45 = vector.load %arg7[%c1, %c0_29, %c0_30] : memref<4x128x128xbf16, #tpu.memory_space<vmem>>, vector<1x128x128xbf16>
    %46 = vector.shape_cast %45 : vector<1x128x128xbf16> to vector<128x128xbf16>
    %cst_31 = arith.constant dense<0.000000e+00> : vector<16x128xf32>
    %47 = tpu.matmul %44, %46, %cst_31 {dimension_numbers = #tpu.dot_dimension_numbers<[1], [0], [0], [1], [0, 0, 1, 1], [], []>} : vector<16x128xbf16>, vector<128x128xbf16>, vector<16x128xf32> -> vector<16x128xf32>
    %c1_32 = arith.constant 1 : index
    %c0_33 = arith.constant 0 : index
    %c0_34 = arith.constant 0 : index
    %48 = vector.load %arg8[%c1_32, %c0_33, %c0_34] : memref<4x1x128xf32, #tpu.memory_space<vmem>>, vector<1x1x128xf32>
    %49 = vector.shape_cast %48 : vector<1x1x128xf32> to vector<1x128xf32>
    %50 = vector.broadcast %49 : vector<1x128xf32> to vector<16x128xf32>
    %51 = arith.addf %47, %50 : vector<16x128xf32>
    %cst_35 = arith.constant dense<0xFF800000> : vector<16xf32>
    %52 = vector.multi_reduction <maximumf>, %51, %cst_35 [1] : vector<16x128xf32> to vector<16xf32>
    %53 = vector.shape_cast %52 : vector<16xf32> to vector<16x1xf32>
    %54 = vector.broadcast %53 : vector<16x1xf32> to vector<16x128xf32>
    %55 = arith.subf %51, %54 : vector<16x128xf32>
    %56 = math.exp %55 : vector<16x128xf32>
    %cst_36 = arith.constant dense<0.000000e+00> : vector<16xf32>
    %57 = vector.multi_reduction <add>, %56, %cst_36 [1] : vector<16x128xf32> to vector<16xf32>
    %58 = vector.shape_cast %57 : vector<16xf32> to vector<16x1xf32>
    %59 = math.log %58 : vector<16x1xf32>
    %60 = vector.broadcast %59 : vector<16x1xf32> to vector<16x128xf32>
    %61 = arith.subf %55, %60 : vector<16x128xf32>
    %62 = vector.broadcast %58 : vector<16x1xf32> to vector<16x128xf32>
    %63 = arith.divf %56, %62 : vector<16x128xf32>
    %c0_37 = arith.constant 0 : index
    %c128 = arith.constant 128 : index
    %64 = vector.load %arg10[%c0_37, %c128] : memref<16x512xf32, #tpu.memory_space<vmem>>, vector<16x128xf32>
    tpu.vector_store %arg10[%c0_37, %c128], %61 {strides = array<i32>} : memref<16x512xf32, #tpu.memory_space<vmem>>, vector<16x128xf32>,
    %c0_38 = arith.constant 0 : index
    %c128_39 = arith.constant 128 : index
    %65 = vector.load %arg11[%c0_38, %c128_39] : memref<16x512xf32, #tpu.memory_space<vmem>>, vector<16x128xf32>
    tpu.vector_store %arg11[%c0_38, %c128_39], %63 {strides = array<i32>} : memref<16x512xf32, #tpu.memory_space<vmem>>, vector<16x128xf32>,
    %66 = arith.addf %40, %63 : vector<16x128xf32>
    %67 = vector.extract_strided_slice %19 {offsets = [0, 256], sizes = [16, 128], strides = [1, 1]} : vector<16x512xf32> to vector<16x128xf32>
    %68 = arith.truncf %67 : vector<16x128xf32> to vector<16x128xbf16>
    %c2 = arith.constant 2 : index
    %c0_40 = arith.constant 0 : index
    %c0_41 = arith.constant 0 : index
    %69 = vector.load %arg7[%c2, %c0_40, %c0_41] : memref<4x128x128xbf16, #tpu.memory_space<vmem>>, vector<1x128x128xbf16>
    %70 = vector.shape_cast %69 : vector<1x128x128xbf16> to vector<128x128xbf16>
    %cst_42 = arith.constant dense<0.000000e+00> : vector<16x128xf32>
    %71 = tpu.matmul %68, %70, %cst_42 {dimension_numbers = #tpu.dot_dimension_numbers<[1], [0], [0], [1], [0, 0, 1, 1], [], []>} : vector<16x128xbf16>, vector<128x128xbf16>, vector<16x128xf32> -> vector<16x128xf32>
    %c2_43 = arith.constant 2 : index
    %c0_44 = arith.constant 0 : index
    %c0_45 = arith.constant 0 : index
    %72 = vector.load %arg8[%c2_43, %c0_44, %c0_45] : memref<4x1x128xf32, #tpu.memory_space<vmem>>, vector<1x1x128xf32>
    %73 = vector.shape_cast %72 : vector<1x1x128xf32> to vector<1x128xf32>
    %74 = vector.broadcast %73 : vector<1x128xf32> to vector<16x128xf32>
    %75 = arith.addf %71, %74 : vector<16x128xf32>
    %cst_46 = arith.constant dense<0xFF800000> : vector<16xf32>
    %76 = vector.multi_reduction <maximumf>, %75, %cst_46 [1] : vector<16x128xf32> to vector<16xf32>
    %77 = vector.shape_cast %76 : vector<16xf32> to vector<16x1xf32>
    %78 = vector.broadcast %77 : vector<16x1xf32> to vector<16x128xf32>
    %79 = arith.subf %75, %78 : vector<16x128xf32>
    %80 = math.exp %79 : vector<16x128xf32>
    %cst_47 = arith.constant dense<0.000000e+00> : vector<16xf32>
    %81 = vector.multi_reduction <add>, %80, %cst_47 [1] : vector<16x128xf32> to vector<16xf32>
    %82 = vector.shape_cast %81 : vector<16xf32> to vector<16x1xf32>
    %83 = math.log %82 : vector<16x1xf32>
    %84 = vector.broadcast %83 : vector<16x1xf32> to vector<16x128xf32>
    %85 = arith.subf %79, %84 : vector<16x128xf32>
    %86 = vector.broadcast %82 : vector<16x1xf32> to vector<16x128xf32>
    %87 = arith.divf %80, %86 : vector<16x128xf32>
    %c0_48 = arith.constant 0 : index
    %c256 = arith.constant 256 : index
    %88 = vector.load %arg10[%c0_48, %c256] : memref<16x512xf32, #tpu.memory_space<vmem>>, vector<16x128xf32>
    tpu.vector_store %arg10[%c0_48, %c256], %85 {strides = array<i32>} : memref<16x512xf32, #tpu.memory_space<vmem>>, vector<16x128xf32>,
    %c0_49 = arith.constant 0 : index
    %c256_50 = arith.constant 256 : index
    %89 = vector.load %arg11[%c0_49, %c256_50] : memref<16x512xf32, #tpu.memory_space<vmem>>, vector<16x128xf32>
    tpu.vector_store %arg11[%c0_49, %c256_50], %87 {strides = array<i32>} : memref<16x512xf32, #tpu.memory_space<vmem>>, vector<16x128xf32>,
    %90 = arith.addf %66, %87 : vector<16x128xf32>
    %91 = vector.extract_strided_slice %19 {offsets = [0, 384], sizes = [16, 128], strides = [1, 1]} : vector<16x512xf32> to vector<16x128xf32>
    %92 = arith.truncf %91 : vector<16x128xf32> to vector<16x128xbf16>
    %c3 = arith.constant 3 : index
    %c0_51 = arith.constant 0 : index
    %c0_52 = arith.constant 0 : index
    %93 = vector.load %arg7[%c3, %c0_51, %c0_52] : memref<4x128x128xbf16, #tpu.memory_space<vmem>>, vector<1x128x128xbf16>
    %94 = vector.shape_cast %93 : vector<1x128x128xbf16> to vector<128x128xbf16>
    %cst_53 = arith.constant dense<0.000000e+00> : vector<16x128xf32>
    %95 = tpu.matmul %92, %94, %cst_53 {dimension_numbers = #tpu.dot_dimension_numbers<[1], [0], [0], [1], [0, 0, 1, 1], [], []>} : vector<16x128xbf16>, vector<128x128xbf16>, vector<16x128xf32> -> vector<16x128xf32>
    %c3_54 = arith.constant 3 : index
    %c0_55 = arith.constant 0 : index
    %c0_56 = arith.constant 0 : index
    %96 = vector.load %arg8[%c3_54, %c0_55, %c0_56] : memref<4x1x128xf32, #tpu.memory_space<vmem>>, vector<1x1x128xf32>
    %97 = vector.shape_cast %96 : vector<1x1x128xf32> to vector<1x128xf32>
    %98 = vector.broadcast %97 : vector<1x128xf32> to vector<16x128xf32>
    %99 = arith.addf %95, %98 : vector<16x128xf32>
    %cst_57 = arith.constant dense<0xFF800000> : vector<16xf32>
    %100 = vector.multi_reduction <maximumf>, %99, %cst_57 [1] : vector<16x128xf32> to vector<16xf32>
    %101 = vector.shape_cast %100 : vector<16xf32> to vector<16x1xf32>
    %102 = vector.broadcast %101 : vector<16x1xf32> to vector<16x128xf32>
    %103 = arith.subf %99, %102 : vector<16x128xf32>
    %104 = math.exp %103 : vector<16x128xf32>
    %cst_58 = arith.constant dense<0.000000e+00> : vector<16xf32>
    %105 = vector.multi_reduction <add>, %104, %cst_58 [1] : vector<16x128xf32> to vector<16xf32>
    %106 = vector.shape_cast %105 : vector<16xf32> to vector<16x1xf32>
    %107 = math.log %106 : vector<16x1xf32>
    %108 = vector.broadcast %107 : vector<16x1xf32> to vector<16x128xf32>
    %109 = arith.subf %103, %108 : vector<16x128xf32>
    %110 = vector.broadcast %106 : vector<16x1xf32> to vector<16x128xf32>
    %111 = arith.divf %104, %110 : vector<16x128xf32>
    %c0_59 = arith.constant 0 : index
    %c384 = arith.constant 384 : index
    %112 = vector.load %arg10[%c0_59, %c384] : memref<16x512xf32, #tpu.memory_space<vmem>>, vector<16x128xf32>
    tpu.vector_store %arg10[%c0_59, %c384], %109 {strides = array<i32>} : memref<16x512xf32, #tpu.memory_space<vmem>>, vector<16x128xf32>,
    %c0_60 = arith.constant 0 : index
    %c384_61 = arith.constant 384 : index
    %113 = vector.load %arg11[%c0_60, %c384_61] : memref<16x512xf32, #tpu.memory_space<vmem>>, vector<16x128xf32>
    tpu.vector_store %arg11[%c0_60, %c384_61], %111 {strides = array<i32>} : memref<16x512xf32, #tpu.memory_space<vmem>>, vector<16x128xf32>,
    %114 = arith.addf %90, %111 : vector<16x128xf32>
    %115 = math.log %114 : vector<16x128xf32>
    %c0_62 = arith.constant 0 : index
    %c0_63 = arith.constant 0 : index
    %116 = vector.load %arg12[%c0_62, %c0_63] : memref<16x128xf32, #tpu.memory_space<vmem>>, vector<16x128xf32>
    tpu.vector_store %arg12[%c0_62, %c0_63], %115 {strides = array<i32>} : memref<16x128xf32, #tpu.memory_space<vmem>>, vector<16x128xf32>,
    return
  }
  func.func @transform_0(%arg0: i32) -> (i32, i32) {
    %c0_i32 = arith.constant 0 : i32
    %c0_i32_0 = arith.constant 0 : i32
    return %arg0, %c0_i32 : i32, i32
  }
  func.func @transform_1(%arg0: i32) -> (i32, i32) {
    %c0_i32 = arith.constant 0 : i32
    %c0_i32_0 = arith.constant 0 : i32
    return %arg0, %c0_i32 : i32, i32
  }
  func.func @transform_2(%arg0: i32) -> (i32, i32) {
    %c0_i32 = arith.constant 0 : i32
    %c0_i32_0 = arith.constant 0 : i32
    %c0_i32_1 = arith.constant 0 : i32
    return %c0_i32, %c0_i32_0 : i32, i32
  }
  func.func @transform_3(%arg0: i32) -> (i32, i32) {
    %c0_i32 = arith.constant 0 : i32
    %c0_i32_0 = arith.constant 0 : i32
    %c0_i32_1 = arith.constant 0 : i32
    return %c0_i32, %c0_i32_0 : i32, i32
  }
  func.func @transform_4(%arg0: i32) -> (i32, i32) {
    %c0_i32 = arith.constant 0 : i32
    %c0_i32_0 = arith.constant 0 : i32
    %c0_i32_1 = arith.constant 0 : i32
    return %c0_i32, %c0_i32_0 : i32, i32
  }
  func.func @transform_5(%arg0: i32) -> (i32, i32) {
    %c0_i32 = arith.constant 0 : i32
    %c0_i32_0 = arith.constant 0 : i32
    %c0_i32_1 = arith.constant 0 : i32
    return %c0_i32, %c0_i32_0 : i32, i32
  }
  func.func @transform_6(%arg0: i32) -> (i32, i32, i32) {
    %c0_i32 = arith.constant 0 : i32
    %c0_i32_0 = arith.constant 0 : i32
    %c0_i32_1 = arith.constant 0 : i32
    %c0_i32_2 = arith.constant 0 : i32
    return %c0_i32, %c0_i32_0, %c0_i32_1 : i32, i32, i32
  }
  func.func @transform_7(%arg0: i32) -> (i32, i32, i32) {
    %c0_i32 = arith.constant 0 : i32
    %c0_i32_0 = arith.constant 0 : i32
    %c0_i32_1 = arith.constant 0 : i32
    %c0_i32_2 = arith.constant 0 : i32
    return %c0_i32, %c0_i32_0, %c0_i32_1 : i32, i32, i32
  }
  func.func @transform_8(%arg0: i32) -> (i32, i32) {
    %c0_i32 = arith.constant 0 : i32
    %c0_i32_0 = arith.constant 0 : i32
    return %arg0, %c0_i32 : i32, i32
  }
  func.func @transform_9(%arg0: i32) -> (i32, i32) {
    %c0_i32 = arith.constant 0 : i32
    %c0_i32_0 = arith.constant 0 : i32
    return %arg0, %c0_i32 : i32, i32
  }
  func.func @transform_10(%arg0: i32) -> (i32, i32) {
    %c0_i32 = arith.constant 0 : i32
    %c0_i32_0 = arith.constant 0 : i32
    return %arg0, %c0_i32 : i32, i32
  }
  func.func @transform_11(%arg0: i32) -> (i32, i32) {
    %c0_i32 = arith.constant 0 : i32
    %c0_i32_0 = arith.constant 0 : i32
    return %arg0, %c0_i32 : i32, i32
  }
}

module attributes {stable_mosaic.version = 11 : i64} {
  func.func @_scatt_fused_kernel(%arg0: i32, %arg1: memref<16x128xbf16, #tpu.memory_space<vmem>>, %arg2: memref<16x1xf32, #tpu.memory_space<vmem>>, %arg3: memref<128x128xbf16, #tpu.memory_space<vmem>>, %arg4: memref<1x128xf32, #tpu.memory_space<vmem>>, %arg5: memref<128x512xbf16, #tpu.memory_space<vmem>>, %arg6: memref<1x512xf32, #tpu.memory_space<vmem>>, %arg7: memref<4x128x128xbf16, #tpu.memory_space<vmem>>, %arg8: memref<4x1x128xf32, #tpu.memory_space<vmem>>, %arg9: memref<16x128xbf16, #tpu.memory_space<vmem>>, %arg10: memref<16x512xf32, #tpu.memory_space<vmem>>, %arg11: memref<16x512xf32, #tpu.memory_space<vmem>>, %arg12: memref<16x128xf32, #tpu.memory_space<vmem>>) attributes {dimension_semantics = [#tpu.dimension_semantics<parallel>], iteration_bounds = array<i64: 1>, scalar_prefetch = 0 : i64, scratch_operands = 0 : i64, tpu.core_type = #tpu.core_type<tc>, window_params = [{transform_indices = @transform_0, window_bounds = array<i64: 16, 128>}, {transform_indices = @transform_1, window_bounds = array<i64: 16, 1>}, {pipeline_mode = #tpu.pipeline_mode<synchronous>, transform_indices = @transform_2, window_bounds = array<i64: 128, 128>}, {pipeline_mode = #tpu.pipeline_mode<synchronous>, transform_indices = @transform_3, window_bounds = array<i64: 1, 128>}, {pipeline_mode = #tpu.pipeline_mode<synchronous>, transform_indices = @transform_4, window_bounds = array<i64: 128, 512>}, {pipeline_mode = #tpu.pipeline_mode<synchronous>, transform_indices = @transform_5, window_bounds = array<i64: 1, 512>}, {pipeline_mode = #tpu.pipeline_mode<synchronous>, transform_indices = @transform_6, window_bounds = array<i64: 4, 128, 128>}, {pipeline_mode = #tpu.pipeline_mode<synchronous>, transform_indices = @transform_7, window_bounds = array<i64: 4, 1, 128>}, {transform_indices = @transform_8, window_bounds = array<i64: 16, 128>}, {transform_indices = @transform_9, window_bounds = array<i64: 16, 512>}, {transform_indices = @transform_10, window_bounds = array<i64: 16, 512>}, {transform_indices = @transform_11, window_bounds = array<i64: 16, 128>}]} {
    %c0 = arith.constant 0 : index
    %c0_0 = arith.constant 0 : index
    %0 = vector.load %arg1[%c0, %c0_0] : memref<16x128xbf16, #tpu.memory_space<vmem>>, vector<16x128xbf16>
    %c0_1 = arith.constant 0 : index
    %c0_2 = arith.constant 0 : index
    %1 = vector.load %arg3[%c0_1, %c0_2] : memref<128x128xbf16, #tpu.memory_space<vmem>>, vector<128x128xbf16>
    %cst = arith.constant dense<0.000000e+00> : vector<16x128xf32>
    %2 = tpu.matmul %0, %1, %cst {dimension_numbers = #tpu.dot_dimension_numbers<[1], [0], [0], [1], [0, 0, 1, 1], [], []>} : vector<16x128xbf16>, vector<128x128xbf16>, vector<16x128xf32> -> vector<16x128xf32>
    %c0_3 = arith.constant 0 : index
    %c0_4 = arith.constant 0 : index
    %3 = vector.load %arg4[%c0_3, %c0_4] : memref<1x128xf32, #tpu.memory_space<vmem>>, vector<1x128xf32>
    %4 = vector.broadcast %3 : vector<1x128xf32> to vector<16x128xf32>
    %5 = arith.addf %2, %4 : vector<16x128xf32>
    %cst_5 = arith.constant 0.000000e+00 : f32
    %6 = vector.broadcast %cst_5 : f32 to vector<16x128xf32>
    %7 = arith.maximumf %5, %6 : vector<16x128xf32>
    %c0_6 = arith.constant 0 : index
    %c0_7 = arith.constant 0 : index
    %8 = vector.load %arg2[%c0_6, %c0_7] : memref<16x1xf32, #tpu.memory_space<vmem>>, vector<16x1xf32>
    %9 = vector.broadcast %8 : vector<16x1xf32> to vector<16x128xf32>
    %10 = arith.mulf %7, %9 : vector<16x128xf32>
    %11 = arith.truncf %10 : vector<16x128xf32> to vector<16x128xbf16>
    %c0_8 = arith.constant 0 : index
    %c0_9 = arith.constant 0 : index
    %12 = vector.load %arg9[%c0_8, %c0_9] : memref<16x128xbf16, #tpu.memory_space<vmem>>, vector<16x128xbf16>
    tpu.vector_store %arg9[%c0_8, %c0_9], %11 {strides = array<i32>} : memref<16x128xbf16, #tpu.memory_space<vmem>>, vector<16x128xbf16>,
    %c0_10 = arith.constant 0 : index
    %c0_11 = arith.constant 0 : index
    %13 = vector.load %arg5[%c0_10, %c0_11] : memref<128x512xbf16, #tpu.memory_space<vmem>>, vector<128x512xbf16>
    %cst_12 = arith.constant dense<0.000000e+00> : vector<16x512xf32>
    %14 = tpu.matmul %11, %13, %cst_12 {dimension_numbers = #tpu.dot_dimension_numbers<[1], [0], [0], [1], [0, 0, 1, 1], [], []>} : vector<16x128xbf16>, vector<128x512xbf16>, vector<16x512xf32> -> vector<16x512xf32>
    %c0_13 = arith.constant 0 : index
    %c0_14 = arith.constant 0 : index
    %15 = vector.load %arg6[%c0_13, %c0_14] : memref<1x512xf32, #tpu.memory_space<vmem>>, vector<1x512xf32>
    %16 = vector.broadcast %15 : vector<1x512xf32> to vector<16x512xf32>
    %17 = arith.addf %14, %16 : vector<16x512xf32>
    %cst_15 = arith.constant 0.000000e+00 : f32
    %18 = vector.broadcast %cst_15 : f32 to vector<16x512xf32>
    %19 = arith.maximumf %17, %18 : vector<16x512xf32>
    %20 = vector.extract_strided_slice %19 {offsets = [0, 0], sizes = [16, 128], strides = [1, 1]} : vector<16x512xf32> to vector<16x128xf32>
    %21 = arith.truncf %20 : vector<16x128xf32> to vector<16x128xbf16>
    %c0_16 = arith.constant 0 : index
    %c0_17 = arith.constant 0 : index
    %c0_18 = arith.constant 0 : index
    %22 = vector.load %arg7[%c0_16, %c0_17, %c0_18] : memref<4x128x128xbf16, #tpu.memory_space<vmem>>, vector<1x128x128xbf16>
    %23 = vector.shape_cast %22 : vector<1x128x128xbf16> to vector<128x128xbf16>
    %cst_19 = arith.constant dense<0.000000e+00> : vector<16x128xf32>
    %24 = tpu.matmul %21, %23, %cst_19 {dimension_numbers = #tpu.dot_dimension_numbers<[1], [0], [0], [1], [0, 0, 1, 1], [], []>} : vector<16x128xbf16>, vector<128x128xbf16>, vector<16x128xf32> -> vector<16x128xf32>
    %c0_20 = arith.constant 0 : index
    %c0_21 = arith.constant 0 : index
    %c0_22 = arith.constant 0 : index
    %25 = vector.load %arg8[%c0_20, %c0_21, %c0_22] : memref<4x1x128xf32, #tpu.memory_space<vmem>>, vector<1x1x128xf32>
    %26 = vector.shape_cast %25 : vector<1x1x128xf32> to vector<1x128xf32>
    %27 = vector.broadcast %26 : vector<1x128xf32> to vector<16x128xf32>
    %28 = arith.addf %24, %27 : vector<16x128xf32>
    %cst_23 = arith.constant dense<0xFF800000> : vector<16xf32>
    %29 = vector.multi_reduction <maximumf>, %28, %cst_23 [1] : vector<16x128xf32> to vector<16xf32>
    %30 = vector.shape_cast %29 : vector<16xf32> to vector<16x1xf32>
    %31 = vector.broadcast %30 : vector<16x1xf32> to vector<16x128xf32>
    %32 = arith.subf %28, %31 : vector<16x128xf32>
    %33 = math.exp %32 : vector<16x128xf32>
    %cst_24 = arith.constant dense<0.000000e+00> : vector<16xf32>
    %34 = vector.multi_reduction <add>, %33, %cst_24 [1] : vector<16x128xf32> to vector<16xf32>
    %35 = vector.shape_cast %34 : vector<16xf32> to vector<16x1xf32>
    %36 = math.log %35 : vector<16x1xf32>
    %37 = vector.broadcast %36 : vector<16x1xf32> to vector<16x128xf32>
    %38 = arith.subf %32, %37 : vector<16x128xf32>
    %39 = vector.broadcast %35 : vector<16x1xf32> to vector<16x128xf32>
    %40 = arith.divf %33, %39 : vector<16x128xf32>
    %c0_25 = arith.constant 0 : index
    %c0_26 = arith.constant 0 : index
    %41 = vector.load %arg10[%c0_25, %c0_26] : memref<16x512xf32, #tpu.memory_space<vmem>>, vector<16x128xf32>
    tpu.vector_store %arg10[%c0_25, %c0_26], %38 {strides = array<i32>} : memref<16x512xf32, #tpu.memory_space<vmem>>, vector<16x128xf32>,
    %c0_27 = arith.constant 0 : index
    %c0_28 = arith.constant 0 : index
    %42 = vector.load %arg11[%c0_27, %c0_28] : memref<16x512xf32, #tpu.memory_space<vmem>>, vector<16x128xf32>
    tpu.vector_store %arg11[%c0_27, %c0_28], %40 {strides = array<i32>} : memref<16x512xf32, #tpu.memory_space<vmem>>, vector<16x128xf32>,
    %43 = vector.extract_strided_slice %19 {offsets = [0, 128], sizes = [16, 128], strides = [1, 1]} : vector<16x512xf32> to vector<16x128xf32>
    %44 = arith.truncf %43 : vector<16x128xf32> to vector<16x128xbf16>
    %c1 = arith.constant 1 : index
    %c0_29 = arith.constant 0 : index
    %c0_30 = arith.constant 0 : index
    %45 = vector.load %arg7[%c1, %c0_29, %c0_30] : memref<4x128x128xbf16, #tpu.memory_space<vmem>>, vector<1x128x128xbf16>
    %46 = vector.shape_cast %45 : vector<1x128x128xbf16> to vector<128x128xbf16>
    %cst_31 = arith.constant dense<0.000000e+00> : vector<16x128xf32>
    %47 = tpu.matmul %44, %46, %cst_31 {dimension_numbers = #tpu.dot_dimension_numbers<[1], [0], [0], [1], [0, 0, 1, 1], [], []>} : vector<16x128xbf16>, vector<128x128xbf16>, vector<16x128xf32> -> vector<16x128xf32>
    %c1_32 = arith.constant 1 : index
    %c0_33 = arith.constant 0 : index
    %c0_34 = arith.constant 0 : index
    %48 = vector.load %arg8[%c1_32, %c0_33, %c0_34] : memref<4x1x128xf32, #tpu.memory_space<vmem>>, vector<1x1x128xf32>
    %49 = vector.shape_cast %48 : vector<1x1x128xf32> to vector<1x128xf32>
    %50 = vector.broadcast %49 : vector<1x128xf32> to vector<16x128xf32>
    %51 = arith.addf %47, %50 : vector<16x128xf32>
    %cst_35 = arith.constant dense<0xFF800000> : vector<16xf32>
    %52 = vector.multi_reduction <maximumf>, %51, %cst_35 [1] : vector<16x128xf32> to vector<16xf32>
    %53 = vector.shape_cast %52 : vector<16xf32> to vector<16x1xf32>
    %54 = vector.broadcast %53 : vector<16x1xf32> to vector<16x128xf32>
    %55 = arith.subf %51, %54 : vector<16x128xf32>
    %56 = math.exp %55 : vector<16x128xf32>
    %cst_36 = arith.constant dense<0.000000e+00> : vector<16xf32>
    %57 = vector.multi_reduction <add>, %56, %cst_36 [1] : vector<16x128xf32> to vector<16xf32>
    %58 = vector.shape_cast %57 : vector<16xf32> to vector<16x1xf32>
    %59 = math.log %58 : vector<16x1xf32>
    %60 = vector.broadcast %59 : vector<16x1xf32> to vector<16x128xf32>
    %61 = arith.subf %55, %60 : vector<16x128xf32>
    %62 = vector.broadcast %58 : vector<16x1xf32> to vector<16x128xf32>
    %63 = arith.divf %56, %62 : vector<16x128xf32>
    %c0_37 = arith.constant 0 : index
    %c128 = arith.constant 128 : index
    %64 = vector.load %arg10[%c0_37, %c128] : memref<16x512xf32, #tpu.memory_space<vmem>>, vector<16x128xf32>
    tpu.vector_store %arg10[%c0_37, %c128], %61 {strides = array<i32>} : memref<16x512xf32, #tpu.memory_space<vmem>>, vector<16x128xf32>,
    %c0_38 = arith.constant 0 : index
    %c128_39 = arith.constant 128 : index
    %65 = vector.load %arg11[%c0_38, %c128_39] : memref<16x512xf32, #tpu.memory_space<vmem>>, vector<16x128xf32>
    tpu.vector_store %arg11[%c0_38, %c128_39], %63 {strides = array<i32>} : memref<16x512xf32, #tpu.memory_space<vmem>>, vector<16x128xf32>,
    %66 = arith.addf %40, %63 : vector<16x128xf32>
    %67 = vector.extract_strided_slice %19 {offsets = [0, 256], sizes = [16, 128], strides = [1, 1]} : vector<16x512xf32> to vector<16x128xf32>
    %68 = arith.truncf %67 : vector<16x128xf32> to vector<16x128xbf16>
    %c2 = arith.constant 2 : index
    %c0_40 = arith.constant 0 : index
    %c0_41 = arith.constant 0 : index
    %69 = vector.load %arg7[%c2, %c0_40, %c0_41] : memref<4x128x128xbf16, #tpu.memory_space<vmem>>, vector<1x128x128xbf16>
    %70 = vector.shape_cast %69 : vector<1x128x128xbf16> to vector<128x128xbf16>
    %cst_42 = arith.constant dense<0.000000e+00> : vector<16x128xf32>
    %71 = tpu.matmul %68, %70, %cst_42 {dimension_numbers = #tpu.dot_dimension_numbers<[1], [0], [0], [1], [0, 0, 1, 1], [], []>} : vector<16x128xbf16>, vector<128x128xbf16>, vector<16x128xf32> -> vector<16x128xf32>
    %c2_43 = arith.constant 2 : index
    %c0_44 = arith.constant 0 : index
    %c0_45 = arith.constant 0 : index
    %72 = vector.load %arg8[%c2_43, %c0_44, %c0_45] : memref<4x1x128xf32, #tpu.memory_space<vmem>>, vector<1x1x128xf32>
    %73 = vector.shape_cast %72 : vector<1x1x128xf32> to vector<1x128xf32>
    %74 = vector.broadcast %73 : vector<1x128xf32> to vector<16x128xf32>
    %75 = arith.addf %71, %74 : vector<16x128xf32>
    %cst_46 = arith.constant dense<0xFF800000> : vector<16xf32>
    %76 = vector.multi_reduction <maximumf>, %75, %cst_46 [1] : vector<16x128xf32> to vector<16xf32>
    %77 = vector.shape_cast %76 : vector<16xf32> to vector<16x1xf32>
    %78 = vector.broadcast %77 : vector<16x1xf32> to vector<16x128xf32>
    %79 = arith.subf %75, %78 : vector<16x128xf32>
    %80 = math.exp %79 : vector<16x128xf32>
    %cst_47 = arith.constant dense<0.000000e+00> : vector<16xf32>
    %81 = vector.multi_reduction <add>, %80, %cst_47 [1] : vector<16x128xf32> to vector<16xf32>
    %82 = vector.shape_cast %81 : vector<16xf32> to vector<16x1xf32>
    %83 = math.log %82 : vector<16x1xf32>
    %84 = vector.broadcast %83 : vector<16x1xf32> to vector<16x128xf32>
    %85 = arith.subf %79, %84 : vector<16x128xf32>
    %86 = vector.broadcast %82 : vector<16x1xf32> to vector<16x128xf32>
    %87 = arith.divf %80, %86 : vector<16x128xf32>
    %c0_48 = arith.constant 0 : index
    %c256 = arith.constant 256 : index
    %88 = vector.load %arg10[%c0_48, %c256] : memref<16x512xf32, #tpu.memory_space<vmem>>, vector<16x128xf32>
    tpu.vector_store %arg10[%c0_48, %c256], %85 {strides = array<i32>} : memref<16x512xf32, #tpu.memory_space<vmem>>, vector<16x128xf32>,
    %c0_49 = arith.constant 0 : index
    %c256_50 = arith.constant 256 : index
    %89 = vector.load %arg11[%c0_49, %c256_50] : memref<16x512xf32, #tpu.memory_space<vmem>>, vector<16x128xf32>
    tpu.vector_store %arg11[%c0_49, %c256_50], %87 {strides = array<i32>} : memref<16x512xf32, #tpu.memory_space<vmem>>, vector<16x128xf32>,
    %90 = arith.addf %66, %87 : vector<16x128xf32>
    %91 = vector.extract_strided_slice %19 {offsets = [0, 384], sizes = [16, 128], strides = [1, 1]} : vector<16x512xf32> to vector<16x128xf32>
    %92 = arith.truncf %91 : vector<16x128xf32> to vector<16x128xbf16>
    %c3 = arith.constant 3 : index
    %c0_51 = arith.constant 0 : index
    %c0_52 = arith.constant 0 : index
    %93 = vector.load %arg7[%c3, %c0_51, %c0_52] : memref<4x128x128xbf16, #tpu.memory_space<vmem>>, vector<1x128x128xbf16>
    %94 = vector.shape_cast %93 : vector<1x128x128xbf16> to vector<128x128xbf16>
    %cst_53 = arith.constant dense<0.000000e+00> : vector<16x128xf32>
    %95 = tpu.matmul %92, %94, %cst_53 {dimension_numbers = #tpu.dot_dimension_numbers<[1], [0], [0], [1], [0, 0, 1, 1], [], []>} : vector<16x128xbf16>, vector<128x128xbf16>, vector<16x128xf32> -> vector<16x128xf32>
    %c3_54 = arith.constant 3 : index
    %c0_55 = arith.constant 0 : index
    %c0_56 = arith.constant 0 : index
    %96 = vector.load %arg8[%c3_54, %c0_55, %c0_56] : memref<4x1x128xf32, #tpu.memory_space<vmem>>, vector<1x1x128xf32>
    %97 = vector.shape_cast %96 : vector<1x1x128xf32> to vector<1x128xf32>
    %98 = vector.broadcast %97 : vector<1x128xf32> to vector<16x128xf32>
    %99 = arith.addf %95, %98 : vector<16x128xf32>
    %cst_57 = arith.constant dense<0xFF800000> : vector<16xf32>
    %100 = vector.multi_reduction <maximumf>, %99, %cst_57 [1] : vector<16x128xf32> to vector<16xf32>
    %101 = vector.shape_cast %100 : vector<16xf32> to vector<16x1xf32>
    %102 = vector.broadcast %101 : vector<16x1xf32> to vector<16x128xf32>
    %103 = arith.subf %99, %102 : vector<16x128xf32>
    %104 = math.exp %103 : vector<16x128xf32>
    %cst_58 = arith.constant dense<0.000000e+00> : vector<16xf32>
    %105 = vector.multi_reduction <add>, %104, %cst_58 [1] : vector<16x128xf32> to vector<16xf32>
    %106 = vector.shape_cast %105 : vector<16xf32> to vector<16x1xf32>
    %107 = math.log %106 : vector<16x1xf32>
    %108 = vector.broadcast %107 : vector<16x1xf32> to vector<16x128xf32>
    %109 = arith.subf %103, %108 : vector<16x128xf32>
    %110 = vector.broadcast %106 : vector<16x1xf32> to vector<16x128xf32>
    %111 = arith.divf %104, %110 : vector<16x128xf32>
    %c0_59 = arith.constant 0 : index
    %c384 = arith.constant 384 : index
    %112 = vector.load %arg10[%c0_59, %c384] : memref<16x512xf32, #tpu.memory_space<vmem>>, vector<16x128xf32>
    tpu.vector_store %arg10[%c0_59, %c384], %109 {strides = array<i32>} : memref<16x512xf32, #tpu.memory_space<vmem>>, vector<16x128xf32>,
    %c0_60 = arith.constant 0 : index
    %c384_61 = arith.constant 384 : index
    %113 = vector.load %arg11[%c0_60, %c384_61] : memref<16x512xf32, #tpu.memory_space<vmem>>, vector<16x128xf32>
    tpu.vector_store %arg11[%c0_60, %c384_61], %111 {strides = array<i32>} : memref<16x512xf32, #tpu.memory_space<vmem>>, vector<16x128xf32>,
    %114 = arith.addf %90, %111 : vector<16x128xf32>
    %115 = math.log %114 : vector<16x128xf32>
    %c0_62 = arith.constant 0 : index
    %c0_63 = arith.constant 0 : index
    %116 = vector.load %arg12[%c0_62, %c0_63] : memref<16x128xf32, #tpu.memory_space<vmem>>, vector<16x128xf32>
    tpu.vector_store %arg12[%c0_62, %c0_63], %115 {strides = array<i32>} : memref<16x128xf32, #tpu.memory_space<vmem>>, vector<16x128xf32>,
    return
  }
  func.func @transform_0(%arg0: i32) -> (i32, i32) {
    %c0_i32 = arith.constant 0 : i32
    %c0_i32_0 = arith.constant 0 : i32
    return %arg0, %c0_i32 : i32, i32
  }
  func.func @transform_1(%arg0: i32) -> (i32, i32) {
    %c0_i32 = arith.constant 0 : i32
    %c0_i32_0 = arith.constant 0 : i32
    return %arg0, %c0_i32 : i32, i32
  }
  func.func @transform_2(%arg0: i32) -> (i32, i32) {
    %c0_i32 = arith.constant 0 : i32
    %c0_i32_0 = arith.constant 0 : i32
    %c0_i32_1 = arith.constant 0 : i32
    return %c0_i32, %c0_i32_0 : i32, i32
  }
  func.func @transform_3(%arg0: i32) -> (i32, i32) {
    %c0_i32 = arith.constant 0 : i32
    %c0_i32_0 = arith.constant 0 : i32
    %c0_i32_1 = arith.constant 0 : i32
    return %c0_i32, %c0_i32_0 : i32, i32
  }
  func.func @transform_4(%arg0: i32) -> (i32, i32) {
    %c0_i32 = arith.constant 0 : i32
    %c0_i32_0 = arith.constant 0 : i32
    %c0_i32_1 = arith.constant 0 : i32
    return %c0_i32, %c0_i32_0 : i32, i32
  }
  func.func @transform_5(%arg0: i32) -> (i32, i32) {
    %c0_i32 = arith.constant 0 : i32
    %c0_i32_0 = arith.constant 0 : i32
    %c0_i32_1 = arith.constant 0 : i32
    return %c0_i32, %c0_i32_0 : i32, i32
  }
  func.func @transform_6(%arg0: i32) -> (i32, i32, i32) {
    %c0_i32 = arith.constant 0 : i32
    %c0_i32_0 = arith.constant 0 : i32
    %c0_i32_1 = arith.constant 0 : i32
    %c0_i32_2 = arith.constant 0 : i32
    return %c0_i32, %c0_i32_0, %c0_i32_1 : i32, i32, i32
  }
  func.func @transform_7(%arg0: i32) -> (i32, i32, i32) {
    %c0_i32 = arith.constant 0 : i32
    %c0_i32_0 = arith.constant 0 : i32
    %c0_i32_1 = arith.constant 0 : i32
    %c0_i32_2 = arith.constant 0 : i32
    return %c0_i32, %c0_i32_0, %c0_i32_1 : i32, i32, i32
  }
  func.func @transform_8(%arg0: i32) -> (i32, i32) {
    %c0_i32 = arith.constant 0 : i32
    %c0_i32_0 = arith.constant 0 : i32
    return %arg0, %c0_i32 : i32, i32
  }
  func.func @transform_9(%arg0: i32) -> (i32, i32) {
    %c0_i32 = arith.constant 0 : i32
    %c0_i32_0 = arith.constant 0 : i32
    return %arg0, %c0_i32 : i32, i32
  }
  func.func @transform_10(%arg0: i32) -> (i32, i32) {
    %c0_i32 = arith.constant 0 : i32
    %c0_i32_0 = arith.constant 0 : i32
    return %arg0, %c0_i32 : i32, i32
  }
  func.func @transform_11(%arg0: i32) -> (i32, i32) {
    %c0_i32 = arith.constant 0 : i32
    %c0_i32_0 = arith.constant 0 : i32
    return %arg0, %c0_i32 : i32, i32
  }
}

</mosaic_0001>

<bundles_post_ra>
// kernel: _forward_impl.1
= control target key start
LH: loop header
LB: loop body
LE: loop exit
PB: predicated region body
PF: predicated region fallthrough
CT: control target
= control target key end

     0   :  { %v1514_v0 = vmov 0.0   ;;  %vm1515_vm0 = vmmov 0   ;;  %v1516_v2 = vmov 0   ;;  %s1979_s2 = inlined_call_operand.vmem [shape: bf16[128,128], index: 2, kind: input, shape index: {}]   ;;  %s1980_s1 = inlined_call_operand.vmem [shape: f32[16,1], index: 1, kind: input, shape index: {}]   ;;  %s1981_s0 = inlined_call_operand.vmem [shape: bf16[16,128], index: 0, kind: input, shape index: {}]   ;;  %s1982_s4 = inlined_call_operand.vmem [shape: bf16[128,512], index: 4, kind: input, shape index: {}]   ;;  %s1983_s6 = inlined_call_operand.vmem [shape: bf16[4,128,128], index: 6, kind: input, shape index: {}]   ;;  %s1984_s3 = inlined_call_operand.vmem [shape: f32[1,128], index: 3, kind: input, shape index: {}]   ;;  %s1985_s8 = inlined_call_operand.vmem [shape: bf16[16,128], index: 8, kind: output, shape index: {0}]   ;;  %s1986_s5 = inlined_call_operand.vmem [shape: f32[1,512], index: 5, kind: input, shape index: {}]   ;;  %s1987_s7 = inlined_call_operand.vmem [shape: f32[4,1,128], index: 7, kind: input, shape index: {}]   ;;  %s1988_s10 = inlined_call_operand.vmem [shape: f32[16,512], index: 10, kind: output, shape index: {2}]   ;;  %s1989_s9 = inlined_call_operand.vmem [shape: f32[16,512], index: 9, kind: output, shape index: {1}]   ;;  %s1990_s11 = inlined_call_operand.vmem [shape: f32[16,128], index: 11, kind: output, shape index: {3}]  }
   0x1   :  { %1269 = vmatprep.subr.bf16.mxu0 %v1514_v0  ;;  %v1373_v1 = vld [vmem:[%s1979_s2] sm:$0xff]   ;;  %1285 = vmatprep.mubr.msk.bf16.mxu0 %vm1515_vm0, %v1514_v0  ;;  %v1374_v3 = vld [vmem:[%s1979_s2 + $0x8] sm:$0xff]   ;;  %v1375_v4 = vld [vmem:[%s1979_s2 + $0x10] sm:$0xff]  }
   0x2   :  { %1372 = vset.pattern.permute.xlu0 %v1516_v2  ;;  %426 = vmatprep.mubr.bf16.mxu1 %v1516_v2  ;;  %v1376_v5 = vld [vmem:[%s1979_s2 + $0x18] sm:$0xff]   ;;  %v156_v6 = vld [vmem:[%s1980_s1] sm:$0xff]  ;;  %v157_v8 = vld [vmem:[%s1980_s1 + $0x8] sm:$0xff] }
   0x3   :  { %1270 = vmatpush3.bf16.msra.mxu0 %v1373_v1  ;;  %160 = vperm.xlu0 %1372, %v156_v6   ;;  %v1382_v7 = vld [vmem:[%s1982_s4 + $0x4] ss:$16 sps:$4 sm:$0xff]   ;;  %v1387_v9 = vld [vmem:[%s1982_s4] ss:$16 sps:$4 sm:$0xff]   ;;  %v1378_v14 = vld [vmem:[%s1979_s2 + $0x28] sm:$0xff]  }
   0x4   :  { %1271 = vmatprep.subr.bf16.mxu0 %v1514_v0  ;;  %394 = vmatprep.subr.bf16.mxu1 %v1382_v7  ;;  %v1388_v10 = vld [vmem:[%s1982_s4 + $0x24] ss:$16 sps:$4 sm:$0xff]   ;;  %v1393_v12 = vld [vmem:[%s1982_s4 + $0x20] ss:$16 sps:$4 sm:$0xff]   ;;  %v1380_v19 = vld [vmem:[%s1979_s2 + $0x38] sm:$0xff]  }
   0x5   :  { %v1377_v11 = vld [vmem:[%s1979_s2 + $0x20] sm:$0xff]   ;;  %395 = vmatpush1.bf16.msra.mxu1 %v1387_v9  ;;  %v1379_v17 = vld [vmem:[%s1979_s2 + $0x30] sm:$0xff]   ;;  %v1386_v21 = vld [vmem:[%s1982_s4 + $0xc] ss:$16 sps:$4 sm:$0xff]  }
   0x6   :  { %396 = vmatprep.subr.bf16.mxu1 %v1388_v10  ;;  %v1394_v13 = vld [vmem:[%s1982_s4 + $0x44] ss:$16 sps:$4 sm:$0xff]   ;;  %v1399_v15 = vld [vmem:[%s1982_s4 + $0x40] ss:$16 sps:$4 sm:$0xff]   ;;  %v1384_v25 = vld [vmem:[%s1982_s4 + $0x8] ss:$16 sps:$4 sm:$0xff]  }
   0x7   :  { %1272 = vmatpush3.bf16.msra.mxu0 %v1374_v3  ;;  %165 = vperm.xlu0 %1372, %v157_v8   ;;  %v1400_v16 = vld [vmem:[%s1982_s4 + $0x64] ss:$16 sps:$4 sm:$0xff]   ;;  %v1405_v18 = vld [vmem:[%s1982_s4 + $0x60] ss:$16 sps:$4 sm:$0xff]   ;;  %v1392_v26 = vld [vmem:[%s1982_s4 + $0x2c] ss:$16 sps:$4 sm:$0xff]  }
   0x8   :  { %1273 = vmatprep.subr.bf16.mxu0 %v1514_v0  ;;  %v1406_v20 = vld [vmem:[%s1982_s4 + $0x84] ss:$16 sps:$4 sm:$0xff]   ;;  %v1411_v22 = vld [vmem:[%s1982_s4 + $0x80] ss:$16 sps:$4 sm:$0xff]   ;;  %v1390_v27 = vld [vmem:[%s1982_s4 + $0x28] ss:$16 sps:$4 sm:$0xff]  }
   0x9   :  { %397 = vmatpush1.bf16.msra.mxu1 %v1393_v12  ;;  %v1412_v23 = vld [vmem:[%s1982_s4 + $0xa4] ss:$16 sps:$4 sm:$0xff]   ;;  %v1398_v28 = vld [vmem:[%s1982_s4 + $0x4c] ss:$16 sps:$4 sm:$0xff]   ;;  %v1396_v29 = vld [vmem:[%s1982_s4 + $0x48] ss:$16 sps:$4 sm:$0xff]   ;;  %v214_v12 = vlaneseq }
   0xa   :  { %398 = vmatprep.subr.bf16.mxu1 %v1394_v13  ;;  %v1381_v24 = vld [vmem:[%s1981_s0] sm:$0xff]   ;;  %v1404_v30 = vld [vmem:[%s1982_s4 + $0x6c] ss:$16 sps:$4 sm:$0xff]   ;;  %v1402_v31 = vld [vmem:[%s1982_s4 + $0x68] ss:$16 sps:$4 sm:$0xff]  }
   0xb   :  { %1274 = vmatpush3.bf16.msra.mxu0 %v1375_v4  ;;  %v1410_v32 = vld [vmem:[%s1982_s4 + $0x8c] ss:$16 sps:$4 sm:$0xff]   ;;  %v1408_v33 = vld [vmem:[%s1982_s4 + $0x88] ss:$16 sps:$4 sm:$0xff]   ;;  %v1417_v36 = vld [vmem:[%s1982_s4 + $0xa0] ss:$16 sps:$4 sm:$0xff]  }
   0xc   :  { %1275 = vmatprep.subr.bf16.mxu0 %v1514_v0  ;;  %v1416_v34 = vld [vmem:[%s1982_s4 + $0xac] ss:$16 sps:$4 sm:$0xff]   ;;  %v1414_v35 = vld [vmem:[%s1982_s4 + $0xa8] ss:$16 sps:$4 sm:$0xff]   ;;  %v1418_v37 = vld [vmem:[%s1982_s4 + $0xc4] ss:$16 sps:$4 sm:$0xff]  }
   0xd   :  { %399 = vmatpush1.bf16.msra.mxu1 %v1399_v15  ;;  %v1422_v38 = vld [vmem:[%s1982_s4 + $0xcc] ss:$16 sps:$4 sm:$0xff]   ;;  %v1420_v39 = vld [vmem:[%s1982_s4 + $0xc8] ss:$16 sps:$4 sm:$0xff]   ;;  %v1423_v40 = vld [vmem:[%s1982_s4 + $0xc0] ss:$16 sps:$4 sm:$0xff]  }
   0xe   :  { %400 = vmatprep.subr.bf16.mxu1 %v1400_v16  ;;  %v1424_v41 = vld [vmem:[%s1982_s4 + $0xe4] ss:$16 sps:$4 sm:$0xff]   ;;  %v1428_v42 = vld [vmem:[%s1982_s4 + $0xec] ss:$16 sps:$4 sm:$0xff]   ;;  %v1426_v43 = vld [vmem:[%s1982_s4 + $0xe8] ss:$16 sps:$4 sm:$0xff]  }
   0xf   :  { %1276 = vmatpush3.bf16.msra.mxu0 %v1376_v5  ;;  %v1429_v44 = vld [vmem:[%s1982_s4 + $0xe0] ss:$16 sps:$4 sm:$0xff]   ;;  %v1432_v61 = vld [vmem:[%s1983_s6 + $0x8] sm:$0xff]   ;;  %v1437_v3 = vld [vmem:[%s1983_s6 + $0x58] sm:$0xff]   ;;  %v215_v13 = vshrl.u32 %v214_v12, 7 }
  0x10   :  { %1277 = vmatprep.subr.bf16.mxu0 %v1514_v0  ;;  %v1086_v45 = vld [vmem:[%s1984_s3] ss:$0 sm:$0xff]  ;;  %v1433_v62 = vld [vmem:[%s1983_s6 + $0x48] sm:$0xff]   ;;  %v1434_v63 = vld [vmem:[%s1983_s6 + $0x10] sm:$0xff]  }
  0x11   :  { %401 = vmatpush1.bf16.msra.mxu1 %v1405_v18  ;;  %v1430_v58 = vld [vmem:[%s1983_s6] sm:$0xff]   ;;  %v1435_v1 = vld [vmem:[%s1983_s6 + $0x50] sm:$0xff]   ;;  %v1440_v6 = vld [vmem:[%s1983_s6 + $0x28] sm:$0xff]   ;;  %v224_v15 = vsub.s32 2, %v215_v13  ;;  %v228_v18 = vsub.s32 3, %v215_v13 }
  0x12   :  { %402 = vmatprep.subr.bf16.mxu1 %v1406_v20  ;;  %v1431_v59 = vld [vmem:[%s1983_s6 + $0x40] sm:$0xff]   ;;  %v1441_v7 = vld [vmem:[%s1983_s6 + $0x68] sm:$0xff]   ;;  %v1442_v8 = vld [vmem:[%s1983_s6 + $0x30] sm:$0xff]  }
  0x13   :  { %1278 = vmatpush3.bf16.msra.mxu0 %v1377_v11  ;;  %v1438_v4 = vld [vmem:[%s1983_s6 + $0x20] sm:$0xff]   ;;  %v1443_v9 = vld [vmem:[%s1983_s6 + $0x70] sm:$0xff]   ;;  %v1444_v10 = vld [vmem:[%s1983_s6 + $0x38] sm:$0xff]  }
  0x14   :  { %1279 = vmatprep.subr.bf16.mxu0 %v1514_v0  ;;  %v1439_v5 = vld [vmem:[%s1983_s6 + $0x60] sm:$0xff]   ;;  %v1445_v11 = vld [vmem:[%s1983_s6 + $0x78] sm:$0xff]  }
  0x15   :  { %403 = vmatpush1.bf16.msra.mxu1 %v1411_v22  ;;  %v212_v16 = vld [vmem:[%s1986_s5] sm:$0xf] }
  0x16   :  { %404 = vmatprep.subr.bf16.mxu1 %v1412_v23  ;;  %v225_v20 = vrot.slane %v212_v16, %v224_v15  ;;  %v229_v22 = vrot.slane %v212_v16, %v228_v18 }
  0x17   :  { %1280 = vmatpush3.bf16.msra.mxu0 %v1378_v14  ;;  %v216_v14 = vsub.s32 0, %v215_v13 }
  0x18   :  { %1281 = vmatprep.subr.bf16.mxu0 %v1514_v0 }
  0x19   :  { %405 = vmatpush1.bf16.msra.mxu1 %v1417_v36 }
  0x1a   :  { %406 = vmatprep.subr.bf16.mxu1 %v1418_v37 }
  0x1b   :  { %1282 = vmatpush3.bf16.msra.mxu0 %v1379_v17  ;;  %v220_v17 = vsub.s32 1, %v215_v13 }
  0x1c   :  { %1283 = vmatprep.subr.bf16.mxu0 %v1514_v0 }
  0x1d   :  { %407 = vmatpush1.bf16.msra.mxu1 %v1423_v40 }
  0x1e   :  { %408 = vmatprep.subr.bf16.mxu1 %v1424_v41 }
  0x1f   :  { %1284 = vmatpush3.bf16.msra.mxu0 %v1380_v19  ;;  %v217_v19 = vrot.slane %v212_v16, %v216_v14 }
  0x20   :  { %437 = vmatprep.subr.bf16.mxu0 %v1386_v21  ;;  %v221_v21 = vrot.slane %v212_v16, %v220_v17  ;;  %v1182_v17 = vld [vmem:[%s1987_s7 + $0x2] ss:$0 sm:$0xff] }
  0x21   :  { %409 = vmatpush1.bf16.msra.mxu1 %v1429_v44 }
  0x22   :  { %1286 = vmatmul.mubr.bf16.vlgmr.msra.gmra.mrb[0].mxu0 %v1381_v24  ;;  %1289 = vmatprep.subr.bf16.mxu1 %v1514_v0 }
  0x23   :  { %438 = vmatpush1.bf16.msra.mxu0 %v1384_v25  ;;  %469 = vmatprep.mubr.bf16.mxu0 %v1516_v2  ;;  %v1436_v2 = vld [vmem:[%s1983_s6 + $0x18] sm:$0xff]  }
  0x24   :  { %439 = vmatprep.subr.bf16.mxu0 %v1392_v26 }
  0x27   :  { %440 = vmatpush1.bf16.msra.mxu0 %v1390_v27 }
  0x28   :  { %441 = vmatprep.subr.bf16.mxu0 %v1398_v28 }
  0x2b   :  { %442 = vmatpush1.bf16.msra.mxu0 %v1396_v29 }
  0x2c   :  { %443 = vmatprep.subr.bf16.mxu0 %v1404_v30 }
  0x2f   :  { %444 = vmatpush1.bf16.msra.mxu0 %v1402_v31 }
  0x30   :  { %445 = vmatprep.subr.bf16.mxu0 %v1410_v32 }
  0x33   :  { %446 = vmatpush1.bf16.msra.mxu0 %v1408_v33 }
  0x34   :  { %447 = vmatprep.subr.bf16.mxu0 %v1416_v34 }
  0x37   :  { %448 = vmatpush1.bf16.msra.mxu0 %v1414_v35 }
  0x38   :  { %449 = vmatprep.subr.bf16.mxu0 %v1422_v38 }
  0x3b   :  { %450 = vmatpush1.bf16.msra.mxu0 %v1420_v39 }
  0x3c   :  { %451 = vmatprep.subr.bf16.mxu0 %v1428_v42 }
  0x3f   :  { %452 = vmatpush1.bf16.msra.mxu0 %v1426_v43 }
  0x40   :  { %1309 = vmatprep.subr.bf16.mxu0 %v1514_v0 }
  0x82   :  { %v161_v46 = vpop.permute.xlu0 %160 }
  0x86   :  { %v166_v55 = vpop.permute.xlu0 %165 }
  0xf5   :  { %v147_v47 = vpop.f32.mrb[0].mxu0 }
  0xf6   :  { %v148_v48 = vadd.f32 %v1086_v45, %v147_v47  ;;  %v1287_v49 = vpop.f32.mrb[1].mxu0  ;;  %v1446_v47 = vld [vmem:[%s1983_s6 + $0x80] sm:$0xff]  }
  0xf7   :  { %v150_v50 = vpop.f32.mrb[2].mxu0 }
  0xf8   :  { %v154_v51 = vmax.f32 %v148_v48, 0.0  ;;  %v151_v52 = vadd.f32 %v1086_v45, %v150_v50  ;;  %v1288_v53 = vpop.f32.mrb[3].mxu0  ;;  %v1447_v50 = vld [vmem:[%s1983_s6 + $0xc0] sm:$0xff]  }
  0xf9   :  { %v1448_v53 = vld [vmem:[%s1983_s6 + $0x88] sm:$0xff]  }
  0xfa   :  { %v155_v54 = vmax.f32 %v151_v52, 0.0  ;;  %v168_v56 = vmul.f32 %v161_v46, %v154_v51 }
  0xfc   :  { %v169_v57 = vmul.f32 %v166_v55, %v155_v54  ;;  %v1449_v54 = vld [vmem:[%s1983_s6 + $0xc8] sm:$0xff]   ;;  %v1450_v55 = vld [vmem:[%s1983_s6 + $0x90] sm:$0xff]  }
  0xfe   :  { %v170_v60 = vpack.c.bf16 %v169_v57, %v168_v56  ;;  %v1451_v56 = vld [vmem:[%s1983_s6 + $0xd0] sm:$0xff]   ;;  %v1452_v57 = vld [vmem:[%s1983_s6 + $0x98] sm:$0xff]  }
 0x100   :  { %1223 = vst [vmem:[%s1985_s8] sm:$0xff] %v170_v60   ;;  %427 = vmatmul.mubr.bf16.vlgmr.msra.gmra.mrb[0].mxu1 %v170_v60  ;;  %470 = vmatmul.mubr.bf16.vlgmr.msra.gmra.mrb[4].mxu0 %v170_v60  ;;  %v1455_v60 = vld [vmem:[%s1983_s6 + $0xe0] sm:$0xff]  }
 0x101   :  { %1290 = vmatpush3.bf16.msra.mxu1 %v1430_v58  ;;  %1310 = vmatpush3.bf16.msra.mxu0 %v1431_v59  ;;  %v1453_v58 = vld [vmem:[%s1983_s6 + $0xd8] sm:$0xff]   ;;  %v1454_v59 = vld [vmem:[%s1983_s6 + $0xa0] sm:$0xff]  }
 0x102   :  { %1291 = vmatprep.subr.bf16.mxu1 %v1514_v0  ;;  %1311 = vmatprep.subr.bf16.mxu0 %v1514_v0 }
 0x103   :  { %1305 = vmatprep.mubr.msk.bf16.mxu1 %vm1515_vm0, %v1514_v0  ;;  %1325 = vmatprep.mubr.msk.bf16.mxu0 %vm1515_vm0, %v1514_v0 }
 0x105   :  { %1292 = vmatpush3.bf16.msra.mxu1 %v1432_v61  ;;  %1312 = vmatpush3.bf16.msra.mxu0 %v1433_v62  ;;  %v1456_v61 = vld [vmem:[%s1983_s6 + $0xa8] sm:$0xff]  }
 0x106   :  { %1293 = vmatprep.subr.bf16.mxu1 %v1514_v0  ;;  %1313 = vmatprep.subr.bf16.mxu0 %v1514_v0  ;;  %v1457_v62 = vld [vmem:[%s1983_s6 + $0xe8] sm:$0xff]  }
 0x109   :  { %1294 = vmatpush3.bf16.msra.mxu1 %v1434_v63  ;;  %1314 = vmatpush3.bf16.msra.mxu0 %v1435_v1  ;;  %v1458_v63 = vld [vmem:[%s1983_s6 + $0xb0] sm:$0xff]  }
 0x10a   :  { %1295 = vmatprep.subr.bf16.mxu1 %v1514_v0  ;;  %1315 = vmatprep.subr.bf16.mxu0 %v1514_v0  ;;  %v1459_v1 = vld [vmem:[%s1983_s6 + $0xf0] sm:$0xff]  }
 0x10d   :  { %1296 = vmatpush3.bf16.msra.mxu1 %v1436_v2  ;;  %1316 = vmatpush3.bf16.msra.mxu0 %v1437_v3  ;;  %v1460_v2 = vld [vmem:[%s1983_s6 + $0xb8] sm:$0xff]  }
 0x10e   :  { %1297 = vmatprep.subr.bf16.mxu1 %v1514_v0  ;;  %1317 = vmatprep.subr.bf16.mxu0 %v1514_v0  ;;  %v1461_v3 = vld [vmem:[%s1983_s6 + $0xf8] sm:$0xff]  }
 0x111   :  { %1298 = vmatpush3.bf16.msra.mxu1 %v1438_v4  ;;  %1318 = vmatpush3.bf16.msra.mxu0 %v1439_v5  ;;  %v1130_v4 = vld [vmem:[%s1987_s7] ss:$0 sm:$0xff]  ;;  %v1156_v5 = vld [vmem:[%s1987_s7 + $0x1] ss:$0 sm:$0xff] }
 0x112   :  { %1299 = vmatprep.subr.bf16.mxu1 %v1514_v0  ;;  %1319 = vmatprep.subr.bf16.mxu0 %v1514_v0 }
 0x115   :  { %1300 = vmatpush3.bf16.msra.mxu1 %v1440_v6  ;;  %1320 = vmatpush3.bf16.msra.mxu0 %v1441_v7 }
 0x116   :  { %1301 = vmatprep.subr.bf16.mxu1 %v1514_v0  ;;  %1321 = vmatprep.subr.bf16.mxu0 %v1514_v0 }
 0x119   :  { %1302 = vmatpush3.bf16.msra.mxu1 %v1442_v8  ;;  %1322 = vmatpush3.bf16.msra.mxu0 %v1443_v9 }
 0x11a   :  { %1303 = vmatprep.subr.bf16.mxu1 %v1514_v0  ;;  %1323 = vmatprep.subr.bf16.mxu0 %v1514_v0 }
 0x11d   :  { %1304 = vmatpush3.bf16.msra.mxu1 %v1444_v10  ;;  %1324 = vmatpush3.bf16.msra.mxu0 %v1445_v11 }
 0x11e   :  { %1329 = vmatprep.subr.bf16.mxu1 %v1514_v0  ;;  %1349 = vmatprep.subr.bf16.mxu0 %v1514_v0 }
 0x1d3   :  { %v428_v23 = vpop.f32.mrb[0].mxu1  ;;  %v471_v24 = vpop.f32.mrb[4].mxu0 }
 0x1d4   :  { %v429_v25 = vadd.f32 %v428_v23, %v217_v19  ;;  %v472_v26 = vadd.f32 %v471_v24, %v225_v20  ;;  %v430_v27 = vpop.f32.mrb[1].mxu1  ;;  %v473_v28 = vpop.f32.mrb[5].mxu0 }
 0x1d5   :  { %v431_v29 = vadd.f32 %v430_v27, %v221_v21  ;;  %v474_v30 = vadd.f32 %v473_v28, %v229_v22  ;;  %v432_v31 = vpop.f32.mrb[2].mxu1  ;;  %v475_v32 = vpop.f32.mrb[6].mxu0 }
 0x1d6   :  { %v433_v33 = vadd.f32 %v432_v31, %v217_v19  ;;  %v476_v34 = vadd.f32 %v475_v32, %v225_v20  ;;  %v434_v35 = vpop.f32.mrb[3].mxu1  ;;  %v477_v36 = vpop.f32.mrb[7].mxu0  ;;  %v480_v39 = vmax.f32 %v429_v25, 0.0  ;;  %v482_v40 = vmax.f32 %v472_v26, 0.0 }
 0x1d7   :  { %v435_v37 = vadd.f32 %v434_v35, %v221_v21  ;;  %v478_v38 = vadd.f32 %v477_v36, %v229_v22  ;;  %v481_v43 = vmax.f32 %v431_v29, 0.0  ;;  %v483_v44 = vmax.f32 %v474_v30, 0.0  ;;  %v1208_v22 = vld [vmem:[%s1987_s7 + $0x3] ss:$0 sm:$0xff] }
 0x1d8   :  { %v484_v41 = vmax.f32 %v433_v33, 0.0  ;;  %v486_v42 = vmax.f32 %v476_v34, 0.0 }
 0x1d9   :  { %v485_v45 = vmax.f32 %v435_v37, 0.0  ;;  %v487_v46 = vmax.f32 %v478_v38, 0.0 }
 0x1da   :  { %v488_v48 = vpack.c.bf16 %v484_v41, %v480_v39  ;;  %v774_v49 = vpack.c.bf16 %v486_v42, %v482_v40 }
 0x1db   :  { %v629_v51 = vpack.c.bf16 %v485_v45, %v481_v43  ;;  %v919_v52 = vpack.c.bf16 %v487_v46, %v483_v44 }
 0x1dc   :  { %1306 = vmatmul.mubr.bf16.vlgmr.msra.gmra.mrb[4].mxu1 %v488_v48 }
 0x1dd   :  { %1330 = vmatpush3.bf16.msra.mxu1 %v1446_v47  ;;  %1326 = vmatmul.mubr.bf16.vlgmr.msra.gmra.mrb[8].mxu0 %v629_v51 }
 0x1de   :  { %1350 = vmatpush3.bf16.msra.mxu0 %v1447_v50  ;;  %1331 = vmatprep.subr.bf16.mxu1 %v1514_v0 }
 0x1df   :  { %1351 = vmatprep.subr.bf16.mxu0 %v1514_v0  ;;  %1345 = vmatprep.mubr.msk.bf16.mxu1 %vm1515_vm0, %v1514_v0 }
 0x1e0   :  { %1365 = vmatprep.mubr.msk.bf16.mxu0 %vm1515_vm0, %v1514_v0 }
 0x1e1   :  { %1332 = vmatpush3.bf16.msra.mxu1 %v1448_v53 }
 0x1e2   :  { %1352 = vmatpush3.bf16.msra.mxu0 %v1449_v54  ;;  %1333 = vmatprep.subr.bf16.mxu1 %v1514_v0 }
 0x1e3   :  { %1353 = vmatprep.subr.bf16.mxu0 %v1514_v0 }
 0x1e5   :  { %1334 = vmatpush3.bf16.msra.mxu1 %v1450_v55 }
 0x1e6   :  { %1354 = vmatpush3.bf16.msra.mxu0 %v1451_v56  ;;  %1335 = vmatprep.subr.bf16.mxu1 %v1514_v0 }
 0x1e7   :  { %1355 = vmatprep.subr.bf16.mxu0 %v1514_v0 }
 0x1e9   :  { %1336 = vmatpush3.bf16.msra.mxu1 %v1452_v57 }
 0x1ea   :  { %1356 = vmatpush3.bf16.msra.mxu0 %v1453_v58  ;;  %1337 = vmatprep.subr.bf16.mxu1 %v1514_v0 }
 0x1eb   :  { %1357 = vmatprep.subr.bf16.mxu0 %v1514_v0 }
 0x1ed   :  { %1338 = vmatpush3.bf16.msra.mxu1 %v1454_v59 }
 0x1ee   :  { %1358 = vmatpush3.bf16.msra.mxu0 %v1455_v60  ;;  %1339 = vmatprep.subr.bf16.mxu1 %v1514_v0 }
 0x1ef   :  { %1359 = vmatprep.subr.bf16.mxu0 %v1514_v0 }
 0x1f1   :  { %1340 = vmatpush3.bf16.msra.mxu1 %v1456_v61 }
 0x1f2   :  { %1360 = vmatpush3.bf16.msra.mxu0 %v1457_v62  ;;  %1341 = vmatprep.subr.bf16.mxu1 %v1514_v0 }
 0x1f3   :  { %1361 = vmatprep.subr.bf16.mxu0 %v1514_v0 }
 0x1f5   :  { %1342 = vmatpush3.bf16.msra.mxu1 %v1458_v63 }
 0x1f6   :  { %1362 = vmatpush3.bf16.msra.mxu0 %v1459_v1  ;;  %1343 = vmatprep.subr.bf16.mxu1 %v1514_v0 }
 0x1f7   :  { %1363 = vmatprep.subr.bf16.mxu0 %v1514_v0 }
 0x1f9   :  { %1344 = vmatpush3.bf16.msra.mxu1 %v1460_v2 }
 0x1fa   :  { %1364 = vmatpush3.bf16.msra.mxu0 %v1461_v3 }
 0x1fc   :  { %1346 = vmatmul.mubr.bf16.vlgmr.msra.gmra.mrb[8].mxu1 %v774_v49 }
 0x1fd   :  { %1366 = vmatmul.mubr.bf16.vlgmr.msra.gmra.mrb[12].mxu0 %v919_v52 }
 0x2af   :  { %v594_v6 = vpop.f32.mrb[4].mxu1 }
 0x2b0   :  { %v595_v7 = vadd.f32 %v1130_v4, %v594_v6  ;;  %v1307_v8 = vpop.f32.mrb[5].mxu1  ;;  %v737_v9 = vpop.f32.mrb[8].mxu0 }
 0x2b1   :  { %v738_v10 = vadd.f32 %v1156_v5, %v737_v9  ;;  %v597_v11 = vpop.f32.mrb[6].mxu1  ;;  %v1327_v12 = vpop.f32.mrb[9].mxu0 }
 0x2b2   :  { %601 = vmax.xlane.f32.xlu1 %v595_v7  ;;  %v1308_v0 = vpop.f32.mrb[7].mxu1  ;;  %v740_v13 = vpop.f32.mrb[10].mxu0  ;;  %v598_v15 = vadd.f32 %v1130_v4, %v597_v11 }
 0x2b3   :  { %744 = vmax.xlane.f32.xlu0 %v738_v10  ;;  %v1328_v14 = vpop.f32.mrb[11].mxu0  ;;  %v741_v16 = vadd.f32 %v1156_v5, %v740_v13 }
 0x2b6   :  { %603 = vmax.xlane.f32.xlu1 %v598_v15 }
 0x2ba   :  { %746 = vmax.xlane.f32.xlu1 %v741_v16 }
 0x2cf   :  { %v882_v18 = vpop.f32.mrb[8].mxu1 }
 0x2d0   :  { %v883_v19 = vadd.f32 %v1182_v17, %v882_v18  ;;  %v1347_v20 = vpop.f32.mrb[9].mxu1  ;;  %v1027_v21 = vpop.f32.mrb[12].mxu0 }
 0x2d1   :  { %v885_v23 = vpop.f32.mrb[10].mxu1  ;;  %v1367_v24 = vpop.f32.mrb[13].mxu0  ;;  %v1028_v28 = vadd.f32 %v1208_v22, %v1027_v21 }
 0x2d2   :  { %v1030_v25 = vpop.f32.mrb[14].mxu0  ;;  %889 = vmax.xlane.f32.xlu1 %v883_v19  ;;  %v1348_v26 = vpop.f32.mrb[11].mxu1  ;;  %v886_v29 = vadd.f32 %v1182_v17, %v885_v23 }
 0x2d3   :  { %v1368_v27 = vpop.f32.mrb[15].mxu0  ;;  %v1031_v30 = vadd.f32 %v1208_v22, %v1030_v25 }
 0x2d6   :  { %1034 = vmax.xlane.f32.xlu1 %v1028_v28 }
 0x2da   :  { %891 = vmax.xlane.f32.xlu1 %v886_v29 }
 0x2de   :  { %1036 = vmax.xlane.f32.xlu1 %v1031_v30 }
 0x33f   :  { %v602_v31 = vpop.xlane.xlu1 %601 }
 0x340   :  { %v1873_v32 = vsub.f32 %v595_v7, %v602_v31  ;;  %v745_v33 = vpop.xlane.xlu0 %744 }
 0x341   :  { %v1875_v34 = vsub.f32 %v738_v10, %v745_v33 }
 0x342   :  { %v607_v35 = vmul.f32 1.442695, %v1873_v32 }
 0x343   :  { %v604_v36 = vpop.xlane.xlu1 %603  ;;  %v750_v37 = vmul.f32 1.442695, %v1875_v34 }
 0x344   :  { %1462 = vpow2.f32 %v607_v35  ;;  %v1879_v38 = vsub.f32 %v598_v15, %v604_v36 }
 0x345   :  { %1464 = vpow2.f32 %v750_v37 }
 0x346   :  { %v609_v39 = vmul.f32 1.442695, %v1879_v38 }
 0x347   :  { %v747_v40 = vpop.xlane.xlu1 %746 }
 0x348   :  { %v1882_v41 = vsub.f32 %v741_v16, %v747_v40  ;;  %1466 = vpow2.f32 %v609_v39 }
 0x34a   :  { %v752_v42 = vmul.f32 1.442695, %v1882_v41 }
 0x34c   :  { %1468 = vpow2.f32 %v752_v42 }
 0x34e   :  { %v1463_v43 = vpop.eup %1462 }
 0x34f   :  { %611 = vadd.xlane.f32.xlu1 %v1463_v43  ;;  %v1465_v44 = vpop.eup %1464 }
 0x352   :  { %v1885_v45 = vpop.eup %1466 }
 0x353   :  { %754 = vadd.xlane.f32.xlu1 %v1465_v44 }
 0x356   :  { %v1469_v46 = vpop.eup %1468 }
 0x357   :  { %756 = vadd.xlane.f32.xlu0 %v1469_v46  ;;  %613 = vadd.xlane.f32.xlu1 %v1885_v45 }
 0x35f   :  { %v890_v47 = vpop.xlane.xlu1 %889 }
 0x360   :  { %v1888_v48 = vsub.f32 %v883_v19, %v890_v47 }
 0x362   :  { %v895_v49 = vmul.f32 1.442695, %v1888_v48 }
 0x363   :  { %v1035_v50 = vpop.xlane.xlu1 %1034 }
 0x364   :  { %1470 = vpow2.f32 %v895_v49  ;;  %v1891_v51 = vsub.f32 %v1028_v28, %v1035_v50 }
 0x366   :  { %v1040_v52 = vmul.f32 1.442695, %v1891_v51 }
 0x367   :  { %v892_v53 = vpop.xlane.xlu1 %891 }
 0x368   :  { %1472 = vpow2.f32 %v1040_v52  ;;  %v1894_v54 = vsub.f32 %v886_v29, %v892_v53 }
 0x36a   :  { %v897_v55 = vmul.f32 1.442695, %v1894_v54 }
 0x36b   :  { %v1037_v56 = vpop.xlane.xlu1 %1036 }
 0x36c   :  { %1474 = vpow2.f32 %v897_v55  ;;  %v1897_v57 = vsub.f32 %v1031_v30, %v1037_v56 }
 0x36e   :  { %v1899_v58 = vpop.eup %1470  ;;  %v1042_v59 = vmul.f32 1.442695, %v1897_v57 }
 0x36f   :  { %899 = vadd.xlane.f32.xlu1 %v1899_v58 }
 0x370   :  { %1476 = vpow2.f32 %v1042_v59 }
 0x372   :  { %v1903_v60 = vpop.eup %1472 }
 0x373   :  { %1044 = vadd.xlane.f32.xlu1 %v1903_v60 }
 0x376   :  { %v1906_v61 = vpop.eup %1474 }
 0x377   :  { %901 = vadd.xlane.f32.xlu0 %v1906_v61 }
 0x37a   :  { %v1909_v62 = vpop.eup %1476 }
 0x37b   :  { %1046 = vadd.xlane.f32.xlu0 %v1909_v62 }
 0x3dc   :  { %v612_v63 = vpop.xlane.xlu1 %611 }
 0x3dd   :  { %1478 = vlog2.f32 %v612_v63 }
 0x3de   :  { %1480 = vrcp.f32 %v612_v63 }
 0x3e0   :  { %v755_v1 = vpop.xlane.xlu1 %754 }
 0x3e1   :  { %1482 = vlog2.f32 %v755_v1 }
 0x3e2   :  { %1484 = vrcp.f32 %v755_v1 }
 0x3e4   :  { %v757_v2 = vpop.xlane.xlu0 %756  ;;  %v614_v3 = vpop.xlane.xlu1 %613 }
 0x3e5   :  { %1486 = vlog2.f32 %v757_v2 }
 0x3e6   :  { %1488 = vrcp.f32 %v757_v2 }
 0x3e7   :  { %v1479_v4 = vpop.eup %1478  ;;  %1490 = vlog2.f32 %v614_v3 }
 0x3e8   :  { %v1481_v5 = vpop.eup %1480  ;;  %v616_v6 = vmul.f32 0.6931472, %v1479_v4  ;;  %1492 = vrcp.f32 %v614_v3 }
 0x3e9   :  { %v622_v7 = vmul.f32 %v1481_v5, %v1463_v43 }
 0x3ea   :  { %v619_v8 = vsub.f32 %v1873_v32, %v616_v6 }
 0x3eb   :  { %v1483_v9 = vpop.eup %1482  ;;  %627 = vst [vmem:[%s1988_s10] sm:$0xff] %v622_v7 }
 0x3ec   :  { %v1485_v10 = vpop.eup %1484  ;;  %625 = vst [vmem:[%s1989_s9] sm:$0xff] %v619_v8  ;;  %v759_v11 = vmul.f32 0.6931472, %v1483_v9 }
 0x3ed   :  { %v765_v12 = vmul.f32 %v1485_v10, %v1465_v44 }
 0x3ee   :  { %v762_v0 = vsub.f32 %v1875_v34, %v759_v11 }
 0x3ef   :  { %v1487_v13 = vpop.eup %1486  ;;  %770 = vst [vmem:[%s1988_s10 + $0x8] sm:$0xff] %v765_v12  ;;  %v772_v33 = vadd.f32 %v765_v12, %v622_v7 }
 0x3f0   :  { %v1489_v14 = vpop.eup %1488  ;;  %768 = vst [vmem:[%s1989_s9 + $0x8] sm:$0xff] %v762_v0  ;;  %v761_v15 = vmul.f32 0.6931472, %v1487_v13 }
 0x3f1   :  { %v1491_v16 = vpop.eup %1490  ;;  %v767_v17 = vmul.f32 %v1489_v14, %v1469_v46 }
 0x3f2   :  { %v1493_v18 = vpop.eup %1492  ;;  %v763_v19 = vsub.f32 %v1882_v41, %v761_v15  ;;  %v618_v20 = vmul.f32 0.6931472, %v1491_v16 }
 0x3f3   :  { %771 = vst [vmem:[%s1988_s10 + $0x28] sm:$0xff] %v767_v17  ;;  %v624_v21 = vmul.f32 %v1493_v18, %v1885_v45 }
 0x3f4   :  { %769 = vst [vmem:[%s1989_s9 + $0x28] sm:$0xff] %v763_v19  ;;  %v620_v22 = vsub.f32 %v1879_v38, %v618_v20 }
 0x3f5   :  { %628 = vst [vmem:[%s1988_s10 + $0x20] sm:$0xff] %v624_v21  ;;  %v773_v46 = vadd.f32 %v767_v17, %v624_v21 }
 0x3f6   :  { %626 = vst [vmem:[%s1989_s9 + $0x20] sm:$0xff] %v620_v22 }
 0x3fc   :  { %v900_v23 = vpop.xlane.xlu1 %899 }
 0x3fd   :  { %1494 = vlog2.f32 %v900_v23 }
 0x3fe   :  { %1496 = vrcp.f32 %v900_v23 }
 0x400   :  { %v1045_v24 = vpop.xlane.xlu1 %1044 }
 0x401   :  { %1498 = vlog2.f32 %v1045_v24 }
 0x402   :  { %1500 = vrcp.f32 %v1045_v24 }
 0x404   :  { %v902_v25 = vpop.xlane.xlu0 %901 }
 0x405   :  { %1502 = vlog2.f32 %v902_v25 }
 0x406   :  { %1504 = vrcp.f32 %v902_v25 }
 0x407   :  { %v1495_v26 = vpop.eup %1494 }
 0x408   :  { %v1497_v27 = vpop.eup %1496  ;;  %v904_v28 = vmul.f32 0.6931472, %v1495_v26  ;;  %v1047_v29 = vpop.xlane.xlu0 %1046 }
 0x409   :  { %v910_v30 = vmul.f32 %v1497_v27, %v1899_v58  ;;  %1506 = vlog2.f32 %v1047_v29 }
 0x40a   :  { %v907_v31 = vsub.f32 %v1888_v48, %v904_v28  ;;  %1508 = vrcp.f32 %v1047_v29 }
 0x40b   :  { %v1499_v32 = vpop.eup %1498  ;;  %915 = vst [vmem:[%s1988_s10 + $0x10] sm:$0xff] %v910_v30  ;;  %v917_v36 = vadd.f32 %v910_v30, %v772_v33 }
 0x40c   :  { %v1501_v34 = vpop.eup %1500  ;;  %913 = vst [vmem:[%s1989_s9 + $0x10] sm:$0xff] %v907_v31  ;;  %v1049_v35 = vmul.f32 0.6931472, %v1499_v32 }
 0x40d   :  { %v1055_v37 = vmul.f32 %v1501_v34, %v1903_v60 }
 0x40e   :  { %v1052_v38 = vsub.f32 %v1891_v51, %v1049_v35 }
 0x40f   :  { %v1503_v39 = vpop.eup %1502  ;;  %1060 = vst [vmem:[%s1988_s10 + $0x18] sm:$0xff] %v1055_v37  ;;  %v1062_v40 = vadd.f32 %v1055_v37, %v917_v36 }
 0x410   :  { %v1505_v41 = vpop.eup %1504  ;;  %1058 = vst [vmem:[%s1989_s9 + $0x18] sm:$0xff] %v1052_v38  ;;  %v906_v42 = vmul.f32 0.6931472, %v1503_v39 }
 0x411   :  { %1510 = vlog2.f32 %v1062_v40  ;;  %v912_v43 = vmul.f32 %v1505_v41, %v1906_v61 }
 0x412   :  { %v908_v44 = vsub.f32 %v1894_v54, %v906_v42 }
 0x413   :  { %v1507_v45 = vpop.eup %1506  ;;  %916 = vst [vmem:[%s1988_s10 + $0x30] sm:$0xff] %v912_v43  ;;  %v918_v49 = vadd.f32 %v912_v43, %v773_v46 }
 0x414   :  { %v1509_v47 = vpop.eup %1508  ;;  %914 = vst [vmem:[%s1989_s9 + $0x30] sm:$0xff] %v908_v44  ;;  %v1051_v48 = vmul.f32 0.6931472, %v1507_v45 }
 0x415   :  { %v1057_v50 = vmul.f32 %v1509_v47, %v1909_v62 }
 0x416   :  { %v1053_v51 = vsub.f32 %v1897_v57, %v1051_v48 }
 0x417   :  { %1061 = vst [vmem:[%s1988_s10 + $0x38] sm:$0xff] %v1057_v50  ;;  %v1063_v52 = vadd.f32 %v1057_v50, %v918_v49 }
 0x418   :  { %1059 = vst [vmem:[%s1989_s9 + $0x38] sm:$0xff] %v1053_v51 }
 0x419   :  { %1512 = vlog2.f32 %v1063_v52 }
 0x41b   :  { %v1511_v53 = vpop.eup %1510 }
 0x41c   :  { %v1065_v54 = vmul.f32 0.6931472, %v1511_v53 }
 0x41e   :  { %1068 = vst [vmem:[%s1990_s11] sm:$0xff] %v1065_v54 }
 0x423   :  { %v1513_v55 = vpop.eup %1512 }
 0x424   :  { %v1067_v56 = vmul.f32 0.6931472, %v1513_v55 }
 0x426   :  { %1069 = vst [vmem:[%s1990_s11 + $0x8] sm:$0xff] %v1067_v56 }

// kernel: _forward_impl.1
= control target key start
LH: loop header
LB: loop body
LE: loop exit
PB: predicated region body
PF: predicated region fallthrough
CT: control target
= control target key end

     0   :  { %v1514_v0 = vmov 0.0   ;;  %vm1515_vm0 = vmmov 0   ;;  %v1516_v2 = vmov 0   ;;  %s1979_s2 = inlined_call_operand.vmem [shape: bf16[128,128], index: 2, kind: input, shape index: {}]   ;;  %s1980_s1 = inlined_call_operand.vmem [shape: f32[16,1], index: 1, kind: input, shape index: {}]   ;;  %s1981_s0 = inlined_call_operand.vmem [shape: bf16[16,128], index: 0, kind: input, shape index: {}]   ;;  %s1982_s4 = inlined_call_operand.vmem [shape: bf16[128,512], index: 4, kind: input, shape index: {}]   ;;  %s1983_s6 = inlined_call_operand.vmem [shape: bf16[4,128,128], index: 6, kind: input, shape index: {}]   ;;  %s1984_s3 = inlined_call_operand.vmem [shape: f32[1,128], index: 3, kind: input, shape index: {}]   ;;  %s1985_s8 = inlined_call_operand.vmem [shape: bf16[16,128], index: 8, kind: output, shape index: {0}]   ;;  %s1986_s5 = inlined_call_operand.vmem [shape: f32[1,512], index: 5, kind: input, shape index: {}]   ;;  %s1987_s7 = inlined_call_operand.vmem [shape: f32[4,1,128], index: 7, kind: input, shape index: {}]   ;;  %s1988_s10 = inlined_call_operand.vmem [shape: f32[16,512], index: 10, kind: output, shape index: {2}]   ;;  %s1989_s9 = inlined_call_operand.vmem [shape: f32[16,512], index: 9, kind: output, shape index: {1}]   ;;  %s1990_s11 = inlined_call_operand.vmem [shape: f32[16,128], index: 11, kind: output, shape index: {3}]  }
   0x1   :  { %1269 = vmatprep.subr.bf16.mxu0 %v1514_v0  ;;  %v1373_v1 = vld [vmem:[%s1979_s2] sm:$0xff]   ;;  %1285 = vmatprep.mubr.msk.bf16.mxu0 %vm1515_vm0, %v1514_v0  ;;  %v1374_v3 = vld [vmem:[%s1979_s2 + $0x8] sm:$0xff]   ;;  %v1375_v4 = vld [vmem:[%s1979_s2 + $0x10] sm:$0xff]  }
   0x2   :  { %1372 = vset.pattern.permute.xlu0 %v1516_v2  ;;  %426 = vmatprep.mubr.bf16.mxu1 %v1516_v2  ;;  %v1376_v5 = vld [vmem:[%s1979_s2 + $0x18] sm:$0xff]   ;;  %v156_v6 = vld [vmem:[%s1980_s1] sm:$0xff]  ;;  %v157_v8 = vld [vmem:[%s1980_s1 + $0x8] sm:$0xff] }
   0x3   :  { %1270 = vmatpush3.bf16.msra.mxu0 %v1373_v1  ;;  %160 = vperm.xlu0 %1372, %v156_v6   ;;  %v1382_v7 = vld [vmem:[%s1982_s4 + $0x4] ss:$16 sps:$4 sm:$0xff]   ;;  %v1387_v9 = vld [vmem:[%s1982_s4] ss:$16 sps:$4 sm:$0xff]   ;;  %v1378_v14 = vld [vmem:[%s1979_s2 + $0x28] sm:$0xff]  }
   0x4   :  { %1271 = vmatprep.subr.bf16.mxu0 %v1514_v0  ;;  %394 = vmatprep.subr.bf16.mxu1 %v1382_v7  ;;  %v1388_v10 = vld [vmem:[%s1982_s4 + $0x24] ss:$16 sps:$4 sm:$0xff]   ;;  %v1393_v12 = vld [vmem:[%s1982_s4 + $0x20] ss:$16 sps:$4 sm:$0xff]   ;;  %v1380_v19 = vld [vmem:[%s1979_s2 + $0x38] sm:$0xff]  }
   0x5   :  { %v1377_v11 = vld [vmem:[%s1979_s2 + $0x20] sm:$0xff]   ;;  %395 = vmatpush1.bf16.msra.mxu1 %v1387_v9  ;;  %v1379_v17 = vld [vmem:[%s1979_s2 + $0x30] sm:$0xff]   ;;  %v1386_v21 = vld [vmem:[%s1982_s4 + $0xc] ss:$16 sps:$4 sm:$0xff]  }
   0x6   :  { %396 = vmatprep.subr.bf16.mxu1 %v1388_v10  ;;  %v1394_v13 = vld [vmem:[%s1982_s4 + $0x44] ss:$16 sps:$4 sm:$0xff]   ;;  %v1399_v15 = vld [vmem:[%s1982_s4 + $0x40] ss:$16 sps:$4 sm:$0xff]   ;;  %v1384_v25 = vld [vmem:[%s1982_s4 + $0x8] ss:$16 sps:$4 sm:$0xff]  }
   0x7   :  { %1272 = vmatpush3.bf16.msra.mxu0 %v1374_v3  ;;  %165 = vperm.xlu0 %1372, %v157_v8   ;;  %v1400_v16 = vld [vmem:[%s1982_s4 + $0x64] ss:$16 sps:$4 sm:$0xff]   ;;  %v1405_v18 = vld [vmem:[%s1982_s4 + $0x60] ss:$16 sps:$4 sm:$0xff]   ;;  %v1392_v26 = vld [vmem:[%s1982_s4 + $0x2c] ss:$16 sps:$4 sm:$0xff]  }
   0x8   :  { %1273 = vmatprep.subr.bf16.mxu0 %v1514_v0  ;;  %v1406_v20 = vld [vmem:[%s1982_s4 + $0x84] ss:$16 sps:$4 sm:$0xff]   ;;  %v1411_v22 = vld [vmem:[%s1982_s4 + $0x80] ss:$16 sps:$4 sm:$0xff]   ;;  %v1390_v27 = vld [vmem:[%s1982_s4 + $0x28] ss:$16 sps:$4 sm:$0xff]  }
   0x9   :  { %397 = vmatpush1.bf16.msra.mxu1 %v1393_v12  ;;  %v1412_v23 = vld [vmem:[%s1982_s4 + $0xa4] ss:$16 sps:$4 sm:$0xff]   ;;  %v1398_v28 = vld [vmem:[%s1982_s4 + $0x4c] ss:$16 sps:$4 sm:$0xff]   ;;  %v1396_v29 = vld [vmem:[%s1982_s4 + $0x48] ss:$16 sps:$4 sm:$0xff]   ;;  %v214_v12 = vlaneseq }
   0xa   :  { %398 = vmatprep.subr.bf16.mxu1 %v1394_v13  ;;  %v1381_v24 = vld [vmem:[%s1981_s0] sm:$0xff]   ;;  %v1404_v30 = vld [vmem:[%s1982_s4 + $0x6c] ss:$16 sps:$4 sm:$0xff]   ;;  %v1402_v31 = vld [vmem:[%s1982_s4 + $0x68] ss:$16 sps:$4 sm:$0xff]  }
   0xb   :  { %1274 = vmatpush3.bf16.msra.mxu0 %v1375_v4  ;;  %v1410_v32 = vld [vmem:[%s1982_s4 + $0x8c] ss:$16 sps:$4 sm:$0xff]   ;;  %v1408_v33 = vld [vmem:[%s1982_s4 + $0x88] ss:$16 sps:$4 sm:$0xff]   ;;  %v1417_v36 = vld [vmem:[%s1982_s4 + $0xa0] ss:$16 sps:$4 sm:$0xff]  }
   0xc   :  { %1275 = vmatprep.subr.bf16.mxu0 %v1514_v0  ;;  %v1416_v34 = vld [vmem:[%s1982_s4 + $0xac] ss:$16 sps:$4 sm:$0xff]   ;;  %v1414_v35 = vld [vmem:[%s1982_s4 + $0xa8] ss:$16 sps:$4 sm:$0xff]   ;;  %v1418_v37 = vld [vmem:[%s1982_s4 + $0xc4] ss:$16 sps:$4 sm:$0xff]  }
   0xd   :  { %399 = vmatpush1.bf16.msra.mxu1 %v1399_v15  ;;  %v1422_v38 = vld [vmem:[%s1982_s4 + $0xcc] ss:$16 sps:$4 sm:$0xff]   ;;  %v1420_v39 = vld [vmem:[%s1982_s4 + $0xc8] ss:$16 sps:$4 sm:$0xff]   ;;  %v1423_v40 = vld [vmem:[%s1982_s4 + $0xc0] ss:$16 sps:$4 sm:$0xff]  }
   0xe   :  { %400 = vmatprep.subr.bf16.mxu1 %v1400_v16  ;;  %v1424_v41 = vld [vmem:[%s1982_s4 + $0xe4] ss:$16 sps:$4 sm:$0xff]   ;;  %v1428_v42 = vld [vmem:[%s1982_s4 + $0xec] ss:$16 sps:$4 sm:$0xff]   ;;  %v1426_v43 = vld [vmem:[%s1982_s4 + $0xe8] ss:$16 sps:$4 sm:$0xff]  }
   0xf   :  { %1276 = vmatpush3.bf16.msra.mxu0 %v1376_v5  ;;  %v1429_v44 = vld [vmem:[%s1982_s4 + $0xe0] ss:$16 sps:$4 sm:$0xff]   ;;  %v1432_v61 = vld [vmem:[%s1983_s6 + $0x8] sm:$0xff]   ;;  %v1437_v3 = vld [vmem:[%s1983_s6 + $0x58] sm:$0xff]   ;;  %v215_v13 = vshrl.u32 %v214_v12, 7 }
  0x10   :  { %1277 = vmatprep.subr.bf16.mxu0 %v1514_v0  ;;  %v1086_v45 = vld [vmem:[%s1984_s3] ss:$0 sm:$0xff]  ;;  %v1433_v62 = vld [vmem:[%s1983_s6 + $0x48] sm:$0xff]   ;;  %v1434_v63 = vld [vmem:[%s1983_s6 + $0x10] sm:$0xff]  }
  0x11   :  { %401 = vmatpush1.bf16.msra.mxu1 %v1405_v18  ;;  %v1430_v58 = vld [vmem:[%s1983_s6] sm:$0xff]   ;;  %v1435_v1 = vld [vmem:[%s1983_s6 + $0x50] sm:$0xff]   ;;  %v1440_v6 = vld [vmem:[%s1983_s6 + $0x28] sm:$0xff]   ;;  %v224_v15 = vsub.s32 2, %v215_v13  ;;  %v228_v18 = vsub.s32 3, %v215_v13 }
  0x12   :  { %402 = vmatprep.subr.bf16.mxu1 %v1406_v20  ;;  %v1431_v59 = vld [vmem:[%s1983_s6 + $0x40] sm:$0xff]   ;;  %v1441_v7 = vld [vmem:[%s1983_s6 + $0x68] sm:$0xff]   ;;  %v1442_v8 = vld [vmem:[%s1983_s6 + $0x30] sm:$0xff]  }
  0x13   :  { %1278 = vmatpush3.bf16.msra.mxu0 %v1377_v11  ;;  %v1438_v4 = vld [vmem:[%s1983_s6 + $0x20] sm:$0xff]   ;;  %v1443_v9 = vld [vmem:[%s1983_s6 + $0x70] sm:$0xff]   ;;  %v1444_v10 = vld [vmem:[%s1983_s6 + $0x38] sm:$0xff]  }
  0x14   :  { %1279 = vmatprep.subr.bf16.mxu0 %v1514_v0  ;;  %v1439_v5 = vld [vmem:[%s1983_s6 + $0x60] sm:$0xff]   ;;  %v1445_v11 = vld [vmem:[%s1983_s6 + $0x78] sm:$0xff]  }
  0x15   :  { %403 = vmatpush1.bf16.msra.mxu1 %v1411_v22  ;;  %v212_v16 = vld [vmem:[%s1986_s5] sm:$0xf] }
  0x16   :  { %404 = vmatprep.subr.bf16.mxu1 %v1412_v23  ;;  %v225_v20 = vrot.slane %v212_v16, %v224_v15  ;;  %v229_v22 = vrot.slane %v212_v16, %v228_v18 }
  0x17   :  { %1280 = vmatpush3.bf16.msra.mxu0 %v1378_v14  ;;  %v216_v14 = vsub.s32 0, %v215_v13 }
  0x18   :  { %1281 = vmatprep.subr.bf16.mxu0 %v1514_v0 }
  0x19   :  { %405 = vmatpush1.bf16.msra.mxu1 %v1417_v36 }
  0x1a   :  { %406 = vmatprep.subr.bf16.mxu1 %v1418_v37 }
  0x1b   :  { %1282 = vmatpush3.bf16.msra.mxu0 %v1379_v17  ;;  %v220_v17 = vsub.s32 1, %v215_v13 }
  0x1c   :  { %1283 = vmatprep.subr.bf16.mxu0 %v1514_v0 }
  0x1d   :  { %407 = vmatpush1.bf16.msra.mxu1 %v1423_v40 }
  0x1e   :  { %408 = vmatprep.subr.bf16.mxu1 %v1424_v41 }
  0x1f   :  { %1284 = vmatpush3.bf16.msra.mxu0 %v1380_v19  ;;  %v217_v19 = vrot.slane %v212_v16, %v216_v14 }
  0x20   :  { %437 = vmatprep.subr.bf16.mxu0 %v1386_v21  ;;  %v221_v21 = vrot.slane %v212_v16, %v220_v17  ;;  %v1182_v17 = vld [vmem:[%s1987_s7 + $0x2] ss:$0 sm:$0xff] }
  0x21   :  { %409 = vmatpush1.bf16.msra.mxu1 %v1429_v44 }
  0x22   :  { %1286 = vmatmul.mubr.bf16.vlgmr.msra.gmra.mrb[0].mxu0 %v1381_v24  ;;  %1289 = vmatprep.subr.bf16.mxu1 %v1514_v0 }
  0x23   :  { %438 = vmatpush1.bf16.msra.mxu0 %v1384_v25  ;;  %469 = vmatprep.mubr.bf16.mxu0 %v1516_v2  ;;  %v1436_v2 = vld [vmem:[%s1983_s6 + $0x18] sm:$0xff]  }
  0x24   :  { %439 = vmatprep.subr.bf16.mxu0 %v1392_v26 }
  0x27   :  { %440 = vmatpush1.bf16.msra.mxu0 %v1390_v27 }
  0x28   :  { %441 = vmatprep.subr.bf16.mxu0 %v1398_v28 }
  0x2b   :  { %442 = vmatpush1.bf16.msra.mxu0 %v1396_v29 }
  0x2c   :  { %443 = vmatprep.subr.bf16.mxu0 %v1404_v30 }
  0x2f   :  { %444 = vmatpush1.bf16.msra.mxu0 %v1402_v31 }
  0x30   :  { %445 = vmatprep.subr.bf16.mxu0 %v1410_v32 }
  0x33   :  { %446 = vmatpush1.bf16.msra.mxu0 %v1408_v33 }
  0x34   :  { %447 = vmatprep.subr.bf16.mxu0 %v1416_v34 }
  0x37   :  { %448 = vmatpush1.bf16.msra.mxu0 %v1414_v35 }
  0x38   :  { %449 = vmatprep.subr.bf16.mxu0 %v1422_v38 }
  0x3b   :  { %450 = vmatpush1.bf16.msra.mxu0 %v1420_v39 }
  0x3c   :  { %451 = vmatprep.subr.bf16.mxu0 %v1428_v42 }
  0x3f   :  { %452 = vmatpush1.bf16.msra.mxu0 %v1426_v43 }
  0x40   :  { %1309 = vmatprep.subr.bf16.mxu0 %v1514_v0 }
  0x82   :  { %v161_v46 = vpop.permute.xlu0 %160 }
  0x86   :  { %v166_v55 = vpop.permute.xlu0 %165 }
  0xf5   :  { %v147_v47 = vpop.f32.mrb[0].mxu0 }
  0xf6   :  { %v148_v48 = vadd.f32 %v1086_v45, %v147_v47  ;;  %v1287_v49 = vpop.f32.mrb[1].mxu0  ;;  %v1446_v47 = vld [vmem:[%s1983_s6 + $0x80] sm:$0xff]  }
  0xf7   :  { %v150_v50 = vpop.f32.mrb[2].mxu0 }
  0xf8   :  { %v154_v51 = vmax.f32 %v148_v48, 0.0  ;;  %v151_v52 = vadd.f32 %v1086_v45, %v150_v50  ;;  %v1288_v53 = vpop.f32.mrb[3].mxu0  ;;  %v1447_v50 = vld [vmem:[%s1983_s6 + $0xc0] sm:$0xff]  }
  0xf9   :  { %v1448_v53 = vld [vmem:[%s1983_s6 + $0x88] sm:$0xff]  }
  0xfa   :  { %v155_v54 = vmax.f32 %v151_v52, 0.0  ;;  %v168_v56 = vmul.f32 %v161_v46, %v154_v51 }
  0xfc   :  { %v169_v57 = vmul.f32 %v166_v55, %v155_v54  ;;  %v1449_v54 = vld [vmem:[%s1983_s6 + $0xc8] sm:$0xff]   ;;  %v1450_v55 = vld [vmem:[%s1983_s6 + $0x90] sm:$0xff]  }
  0xfe   :  { %v170_v60 = vpack.c.bf16 %v169_v57, %v168_v56  ;;  %v1451_v56 = vld [vmem:[%s1983_s6 + $0xd0] sm:$0xff]   ;;  %v1452_v57 = vld [vmem:[%s1983_s6 + $0x98] sm:$0xff]  }
 0x100   :  { %1223 = vst [vmem:[%s1985_s8] sm:$0xff] %v170_v60   ;;  %427 = vmatmul.mubr.bf16.vlgmr.msra.gmra.mrb[0].mxu1 %v170_v60  ;;  %470 = vmatmul.mubr.bf16.vlgmr.msra.gmra.mrb[4].mxu0 %v170_v60  ;;  %v1455_v60 = vld [vmem:[%s1983_s6 + $0xe0] sm:$0xff]  }
 0x101   :  { %1290 = vmatpush3.bf16.msra.mxu1 %v1430_v58  ;;  %1310 = vmatpush3.bf16.msra.mxu0 %v1431_v59  ;;  %v1453_v58 = vld [vmem:[%s1983_s6 + $0xd8] sm:$0xff]   ;;  %v1454_v59 = vld [vmem:[%s1983_s6 + $0xa0] sm:$0xff]  }
 0x102   :  { %1291 = vmatprep.subr.bf16.mxu1 %v1514_v0  ;;  %1311 = vmatprep.subr.bf16.mxu0 %v1514_v0 }
 0x103   :  { %1305 = vmatprep.mubr.msk.bf16.mxu1 %vm1515_vm0, %v1514_v0  ;;  %1325 = vmatprep.mubr.msk.bf16.mxu0 %vm1515_vm0, %v1514_v0 }
 0x105   :  { %1292 = vmatpush3.bf16.msra.mxu1 %v1432_v61  ;;  %1312 = vmatpush3.bf16.msra.mxu0 %v1433_v62  ;;  %v1456_v61 = vld [vmem:[%s1983_s6 + $0xa8] sm:$0xff]  }
 0x106   :  { %1293 = vmatprep.subr.bf16.mxu1 %v1514_v0  ;;  %1313 = vmatprep.subr.bf16.mxu0 %v1514_v0  ;;  %v1457_v62 = vld [vmem:[%s1983_s6 + $0xe8] sm:$0xff]  }
 0x109   :  { %1294 = vmatpush3.bf16.msra.mxu1 %v1434_v63  ;;  %1314 = vmatpush3.bf16.msra.mxu0 %v1435_v1  ;;  %v1458_v63 = vld [vmem:[%s1983_s6 + $0xb0] sm:$0xff]  }
 0x10a   :  { %1295 = vmatprep.subr.bf16.mxu1 %v1514_v0  ;;  %1315 = vmatprep.subr.bf16.mxu0 %v1514_v0  ;;  %v1459_v1 = vld [vmem:[%s1983_s6 + $0xf0] sm:$0xff]  }
 0x10d   :  { %1296 = vmatpush3.bf16.msra.mxu1 %v1436_v2  ;;  %1316 = vmatpush3.bf16.msra.mxu0 %v1437_v3  ;;  %v1460_v2 = vld [vmem:[%s1983_s6 + $0xb8] sm:$0xff]  }
 0x10e   :  { %1297 = vmatprep.subr.bf16.mxu1 %v1514_v0  ;;  %1317 = vmatprep.subr.bf16.mxu0 %v1514_v0  ;;  %v1461_v3 = vld [vmem:[%s1983_s6 + $0xf8] sm:$0xff]  }
 0x111   :  { %1298 = vmatpush3.bf16.msra.mxu1 %v1438_v4  ;;  %1318 = vmatpush3.bf16.msra.mxu0 %v1439_v5  ;;  %v1130_v4 = vld [vmem:[%s1987_s7] ss:$0 sm:$0xff]  ;;  %v1156_v5 = vld [vmem:[%s1987_s7 + $0x1] ss:$0 sm:$0xff] }
 0x112   :  { %1299 = vmatprep.subr.bf16.mxu1 %v1514_v0  ;;  %1319 = vmatprep.subr.bf16.mxu0 %v1514_v0 }
 0x115   :  { %1300 = vmatpush3.bf16.msra.mxu1 %v1440_v6  ;;  %1320 = vmatpush3.bf16.msra.mxu0 %v1441_v7 }
 0x116   :  { %1301 = vmatprep.subr.bf16.mxu1 %v1514_v0  ;;  %1321 = vmatprep.subr.bf16.mxu0 %v1514_v0 }
 0x119   :  { %1302 = vmatpush3.bf16.msra.mxu1 %v1442_v8  ;;  %1322 = vmatpush3.bf16.msra.mxu0 %v1443_v9 }
 0x11a   :  { %1303 = vmatprep.subr.bf16.mxu1 %v1514_v0  ;;  %1323 = vmatprep.subr.bf16.mxu0 %v1514_v0 }
 0x11d   :  { %1304 = vmatpush3.bf16.msra.mxu1 %v1444_v10  ;;  %1324 = vmatpush3.bf16.msra.mxu0 %v1445_v11 }
 0x11e   :  { %1329 = vmatprep.subr.bf16.mxu1 %v1514_v0  ;;  %1349 = vmatprep.subr.bf16.mxu0 %v1514_v0 }
 0x1d3   :  { %v428_v23 = vpop.f32.mrb[0].mxu1  ;;  %v471_v24 = vpop.f32.mrb[4].mxu0 }
 0x1d4   :  { %v429_v25 = vadd.f32 %v428_v23, %v217_v19  ;;  %v472_v26 = vadd.f32 %v471_v24, %v225_v20  ;;  %v430_v27 = vpop.f32.mrb[1].mxu1  ;;  %v473_v28 = vpop.f32.mrb[5].mxu0 }
 0x1d5   :  { %v431_v29 = vadd.f32 %v430_v27, %v221_v21  ;;  %v474_v30 = vadd.f32 %v473_v28, %v229_v22  ;;  %v432_v31 = vpop.f32.mrb[2].mxu1  ;;  %v475_v32 = vpop.f32.mrb[6].mxu0 }
 0x1d6   :  { %v433_v33 = vadd.f32 %v432_v31, %v217_v19  ;;  %v476_v34 = vadd.f32 %v475_v32, %v225_v20  ;;  %v434_v35 = vpop.f32.mrb[3].mxu1  ;;  %v477_v36 = vpop.f32.mrb[7].mxu0  ;;  %v480_v39 = vmax.f32 %v429_v25, 0.0  ;;  %v482_v40 = vmax.f32 %v472_v26, 0.0 }
 0x1d7   :  { %v435_v37 = vadd.f32 %v434_v35, %v221_v21  ;;  %v478_v38 = vadd.f32 %v477_v36, %v229_v22  ;;  %v481_v43 = vmax.f32 %v431_v29, 0.0  ;;  %v483_v44 = vmax.f32 %v474_v30, 0.0  ;;  %v1208_v22 = vld [vmem:[%s1987_s7 + $0x3] ss:$0 sm:$0xff] }
 0x1d8   :  { %v484_v41 = vmax.f32 %v433_v33, 0.0  ;;  %v486_v42 = vmax.f32 %v476_v34, 0.0 }
 0x1d9   :  { %v485_v45 = vmax.f32 %v435_v37, 0.0  ;;  %v487_v46 = vmax.f32 %v478_v38, 0.0 }
 0x1da   :  { %v488_v48 = vpack.c.bf16 %v484_v41, %v480_v39  ;;  %v774_v49 = vpack.c.bf16 %v486_v42, %v482_v40 }
 0x1db   :  { %v629_v51 = vpack.c.bf16 %v485_v45, %v481_v43  ;;  %v919_v52 = vpack.c.bf16 %v487_v46, %v483_v44 }
 0x1dc   :  { %1306 = vmatmul.mubr.bf16.vlgmr.msra.gmra.mrb[4].mxu1 %v488_v48 }
 0x1dd   :  { %1330 = vmatpush3.bf16.msra.mxu1 %v1446_v47  ;;  %1326 = vmatmul.mubr.bf16.vlgmr.msra.gmra.mrb[8].mxu0 %v629_v51 }
 0x1de   :  { %1350 = vmatpush3.bf16.msra.mxu0 %v1447_v50  ;;  %1331 = vmatprep.subr.bf16.mxu1 %v1514_v0 }
 0x1df   :  { %1351 = vmatprep.subr.bf16.mxu0 %v1514_v0  ;;  %1345 = vmatprep.mubr.msk.bf16.mxu1 %vm1515_vm0, %v1514_v0 }
 0x1e0   :  { %1365 = vmatprep.mubr.msk.bf16.mxu0 %vm1515_vm0, %v1514_v0 }
 0x1e1   :  { %1332 = vmatpush3.bf16.msra.mxu1 %v1448_v53 }
 0x1e2   :  { %1352 = vmatpush3.bf16.msra.mxu0 %v1449_v54  ;;  %1333 = vmatprep.subr.bf16.mxu1 %v1514_v0 }
 0x1e3   :  { %1353 = vmatprep.subr.bf16.mxu0 %v1514_v0 }
 0x1e5   :  { %1334 = vmatpush3.bf16.msra.mxu1 %v1450_v55 }
 0x1e6   :  { %1354 = vmatpush3.bf16.msra.mxu0 %v1451_v56  ;;  %1335 = vmatprep.subr.bf16.mxu1 %v1514_v0 }
 0x1e7   :  { %1355 = vmatprep.subr.bf16.mxu0 %v1514_v0 }
 0x1e9   :  { %1336 = vmatpush3.bf16.msra.mxu1 %v1452_v57 }
 0x1ea   :  { %1356 = vmatpush3.bf16.msra.mxu0 %v1453_v58  ;;  %1337 = vmatprep.subr.bf16.mxu1 %v1514_v0 }
 0x1eb   :  { %1357 = vmatprep.subr.bf16.mxu0 %v1514_v0 }
 0x1ed   :  { %1338 = vmatpush3.bf16.msra.mxu1 %v1454_v59 }
 0x1ee   :  { %1358 = vmatpush3.bf16.msra.mxu0 %v1455_v60  ;;  %1339 = vmatprep.subr.bf16.mxu1 %v1514_v0 }
 0x1ef   :  { %1359 = vmatprep.subr.bf16.mxu0 %v1514_v0 }
 0x1f1   :  { %1340 = vmatpush3.bf16.msra.mxu1 %v1456_v61 }
 0x1f2   :  { %1360 = vmatpush3.bf16.msra.mxu0 %v1457_v62  ;;  %1341 = vmatprep.subr.bf16.mxu1 %v1514_v0 }
 0x1f3   :  { %1361 = vmatprep.subr.bf16.mxu0 %v1514_v0 }
 0x1f5   :  { %1342 = vmatpush3.bf16.msra.mxu1 %v1458_v63 }
 0x1f6   :  { %1362 = vmatpush3.bf16.msra.mxu0 %v1459_v1  ;;  %1343 = vmatprep.subr.bf16.mxu1 %v1514_v0 }
 0x1f7   :  { %1363 = vmatprep.subr.bf16.mxu0 %v1514_v0 }
 0x1f9   :  { %1344 = vmatpush3.bf16.msra.mxu1 %v1460_v2 }
 0x1fa   :  { %1364 = vmatpush3.bf16.msra.mxu0 %v1461_v3 }
 0x1fc   :  { %1346 = vmatmul.mubr.bf16.vlgmr.msra.gmra.mrb[8].mxu1 %v774_v49 }
 0x1fd   :  { %1366 = vmatmul.mubr.bf16.vlgmr.msra.gmra.mrb[12].mxu0 %v919_v52 }
 0x2af   :  { %v594_v6 = vpop.f32.mrb[4].mxu1 }
 0x2b0   :  { %v595_v7 = vadd.f32 %v1130_v4, %v594_v6  ;;  %v1307_v8 = vpop.f32.mrb[5].mxu1  ;;  %v737_v9 = vpop.f32.mrb[8].mxu0 }
 0x2b1   :  { %v738_v10 = vadd.f32 %v1156_v5, %v737_v9  ;;  %v597_v11 = vpop.f32.mrb[6].mxu1  ;;  %v1327_v12 = vpop.f32.mrb[9].mxu0 }
 0x2b2   :  { %601 = vmax.xlane.f32.xlu1 %v595_v7  ;;  %v1308_v0 = vpop.f32.mrb[7].mxu1  ;;  %v740_v13 = vpop.f32.mrb[10].mxu0  ;;  %v598_v15 = vadd.f32 %v1130_v4, %v597_v11 }
 0x2b3   :  { %744 = vmax.xlane.f32.xlu0 %v738_v10  ;;  %v1328_v14 = vpop.f32.mrb[11].mxu0  ;;  %v741_v16 = vadd.f32 %v1156_v5, %v740_v13 }
 0x2b6   :  { %603 = vmax.xlane.f32.xlu1 %v598_v15 }
 0x2ba   :  { %746 = vmax.xlane.f32.xlu1 %v741_v16 }
 0x2cf   :  { %v882_v18 = vpop.f32.mrb[8].mxu1 }
 0x2d0   :  { %v883_v19 = vadd.f32 %v1182_v17, %v882_v18  ;;  %v1347_v20 = vpop.f32.mrb[9].mxu1  ;;  %v1027_v21 = vpop.f32.mrb[12].mxu0 }
 0x2d1   :  { %v885_v23 = vpop.f32.mrb[10].mxu1  ;;  %v1367_v24 = vpop.f32.mrb[13].mxu0  ;;  %v1028_v28 = vadd.f32 %v1208_v22, %v1027_v21 }
 0x2d2   :  { %v1030_v25 = vpop.f32.mrb[14].mxu0  ;;  %889 = vmax.xlane.f32.xlu1 %v883_v19  ;;  %v1348_v26 = vpop.f32.mrb[11].mxu1  ;;  %v886_v29 = vadd.f32 %v1182_v17, %v885_v23 }
 0x2d3   :  { %v1368_v27 = vpop.f32.mrb[15].mxu0  ;;  %v1031_v30 = vadd.f32 %v1208_v22, %v1030_v25 }
 0x2d6   :  { %1034 = vmax.xlane.f32.xlu1 %v1028_v28 }
 0x2da   :  { %891 = vmax.xlane.f32.xlu1 %v886_v29 }
 0x2de   :  { %1036 = vmax.xlane.f32.xlu1 %v1031_v30 }
 0x33f   :  { %v602_v31 = vpop.xlane.xlu1 %601 }
 0x340   :  { %v1873_v32 = vsub.f32 %v595_v7, %v602_v31  ;;  %v745_v33 = vpop.xlane.xlu0 %744 }
 0x341   :  { %v1875_v34 = vsub.f32 %v738_v10, %v745_v33 }
 0x342   :  { %v607_v35 = vmul.f32 1.442695, %v1873_v32 }
 0x343   :  { %v604_v36 = vpop.xlane.xlu1 %603  ;;  %v750_v37 = vmul.f32 1.442695, %v1875_v34 }
 0x344   :  { %1462 = vpow2.f32 %v607_v35  ;;  %v1879_v38 = vsub.f32 %v598_v15, %v604_v36 }
 0x345   :  { %1464 = vpow2.f32 %v750_v37 }
 0x346   :  { %v609_v39 = vmul.f32 1.442695, %v1879_v38 }
 0x347   :  { %v747_v40 = vpop.xlane.xlu1 %746 }
 0x348   :  { %v1882_v41 = vsub.f32 %v741_v16, %v747_v40  ;;  %1466 = vpow2.f32 %v609_v39 }
 0x34a   :  { %v752_v42 = vmul.f32 1.442695, %v1882_v41 }
 0x34c   :  { %1468 = vpow2.f32 %v752_v42 }
 0x34e   :  { %v1463_v43 = vpop.eup %1462 }
 0x34f   :  { %611 = vadd.xlane.f32.xlu1 %v1463_v43  ;;  %v1465_v44 = vpop.eup %1464 }
 0x352   :  { %v1885_v45 = vpop.eup %1466 }
 0x353   :  { %754 = vadd.xlane.f32.xlu1 %v1465_v44 }
 0x356   :  { %v1469_v46 = vpop.eup %1468 }
 0x357   :  { %756 = vadd.xlane.f32.xlu0 %v1469_v46  ;;  %613 = vadd.xlane.f32.xlu1 %v1885_v45 }
 0x35f   :  { %v890_v47 = vpop.xlane.xlu1 %889 }
 0x360   :  { %v1888_v48 = vsub.f32 %v883_v19, %v890_v47 }
 0x362   :  { %v895_v49 = vmul.f32 1.442695, %v1888_v48 }
 0x363   :  { %v1035_v50 = vpop.xlane.xlu1 %1034 }
 0x364   :  { %1470 = vpow2.f32 %v895_v49  ;;  %v1891_v51 = vsub.f32 %v1028_v28, %v1035_v50 }
 0x366   :  { %v1040_v52 = vmul.f32 1.442695, %v1891_v51 }
 0x367   :  { %v892_v53 = vpop.xlane.xlu1 %891 }
 0x368   :  { %1472 = vpow2.f32 %v1040_v52  ;;  %v1894_v54 = vsub.f32 %v886_v29, %v892_v53 }
 0x36a   :  { %v897_v55 = vmul.f32 1.442695, %v1894_v54 }
 0x36b   :  { %v1037_v56 = vpop.xlane.xlu1 %1036 }
 0x36c   :  { %1474 = vpow2.f32 %v897_v55  ;;  %v1897_v57 = vsub.f32 %v1031_v30, %v1037_v56 }
 0x36e   :  { %v1899_v58 = vpop.eup %1470  ;;  %v1042_v59 = vmul.f32 1.442695, %v1897_v57 }
 0x36f   :  { %899 = vadd.xlane.f32.xlu1 %v1899_v58 }
 0x370   :  { %1476 = vpow2.f32 %v1042_v59 }
 0x372   :  { %v1903_v60 = vpop.eup %1472 }
 0x373   :  { %1044 = vadd.xlane.f32.xlu1 %v1903_v60 }
 0x376   :  { %v1906_v61 = vpop.eup %1474 }
 0x377   :  { %901 = vadd.xlane.f32.xlu0 %v1906_v61 }
 0x37a   :  { %v1909_v62 = vpop.eup %1476 }
 0x37b   :  { %1046 = vadd.xlane.f32.xlu0 %v1909_v62 }
 0x3dc   :  { %v612_v63 = vpop.xlane.xlu1 %611 }
 0x3dd   :  { %1478 = vlog2.f32 %v612_v63 }
 0x3de   :  { %1480 = vrcp.f32 %v612_v63 }
 0x3e0   :  { %v755_v1 = vpop.xlane.xlu1 %754 }
 0x3e1   :  { %1482 = vlog2.f32 %v755_v1 }
 0x3e2   :  { %1484 = vrcp.f32 %v755_v1 }
 0x3e4   :  { %v757_v2 = vpop.xlane.xlu0 %756  ;;  %v614_v3 = vpop.xlane.xlu1 %613 }
 0x3e5   :  { %1486 = vlog2.f32 %v757_v2 }
 0x3e6   :  { %1488 = vrcp.f32 %v757_v2 }
 0x3e7   :  { %v1479_v4 = vpop.eup %1478  ;;  %1490 = vlog2.f32 %v614_v3 }
 0x3e8   :  { %v1481_v5 = vpop.eup %1480  ;;  %v616_v6 = vmul.f32 0.6931472, %v1479_v4  ;;  %1492 = vrcp.f32 %v614_v3 }
 0x3e9   :  { %v622_v7 = vmul.f32 %v1481_v5, %v1463_v43 }
 0x3ea   :  { %v619_v8 = vsub.f32 %v1873_v32, %v616_v6 }
 0x3eb   :  { %v1483_v9 = vpop.eup %1482  ;;  %627 = vst [vmem:[%s1988_s10] sm:$0xff] %v622_v7 }
 0x3ec   :  { %v1485_v10 = vpop.eup %1484  ;;  %625 = vst [vmem:[%s1989_s9] sm:$0xff] %v619_v8  ;;  %v759_v11 = vmul.f32 0.6931472, %v1483_v9 }
 0x3ed   :  { %v765_v12 = vmul.f32 %v1485_v10, %v1465_v44 }
 0x3ee   :  { %v762_v0 = vsub.f32 %v1875_v34, %v759_v11 }
 0x3ef   :  { %v1487_v13 = vpop.eup %1486  ;;  %770 = vst [vmem:[%s1988_s10 + $0x8] sm:$0xff] %v765_v12  ;;  %v772_v33 = vadd.f32 %v765_v12, %v622_v7 }
 0x3f0   :  { %v1489_v14 = vpop.eup %1488  ;;  %768 = vst [vmem:[%s1989_s9 + $0x8] sm:$0xff] %v762_v0  ;;  %v761_v15 = vmul.f32 0.6931472, %v1487_v13 }
 0x3f1   :  { %v1491_v16 = vpop.eup %1490  ;;  %v767_v17 = vmul.f32 %v1489_v14, %v1469_v46 }
 0x3f2   :  { %v1493_v18 = vpop.eup %1492  ;;  %v763_v19 = vsub.f32 %v1882_v41, %v761_v15  ;;  %v618_v20 = vmul.f32 0.6931472, %v1491_v16 }
 0x3f3   :  { %771 = vst [vmem:[%s1988_s10 + $0x28] sm:$0xff] %v767_v17  ;;  %v624_v21 = vmul.f32 %v1493_v18, %v1885_v45 }
 0x3f4   :  { %769 = vst [vmem:[%s1989_s9 + $0x28] sm:$0xff] %v763_v19  ;;  %v620_v22 = vsub.f32 %v1879_v38, %v618_v20 }
 0x3f5   :  { %628 = vst [vmem:[%s1988_s10 + $0x20] sm:$0xff] %v624_v21  ;;  %v773_v46 = vadd.f32 %v767_v17, %v624_v21 }
 0x3f6   :  { %626 = vst [vmem:[%s1989_s9 + $0x20] sm:$0xff] %v620_v22 }
 0x3fc   :  { %v900_v23 = vpop.xlane.xlu1 %899 }
 0x3fd   :  { %1494 = vlog2.f32 %v900_v23 }
 0x3fe   :  { %1496 = vrcp.f32 %v900_v23 }
 0x400   :  { %v1045_v24 = vpop.xlane.xlu1 %1044 }
 0x401   :  { %1498 = vlog2.f32 %v1045_v24 }
 0x402   :  { %1500 = vrcp.f32 %v1045_v24 }
 0x404   :  { %v902_v25 = vpop.xlane.xlu0 %901 }
 0x405   :  { %1502 = vlog2.f32 %v902_v25 }
 0x406   :  { %1504 = vrcp.f32 %v902_v25 }
 0x407   :  { %v1495_v26 = vpop.eup %1494 }
 0x408   :  { %v1497_v27 = vpop.eup %1496  ;;  %v904_v28 = vmul.f32 0.6931472, %v1495_v26  ;;  %v1047_v29 = vpop.xlane.xlu0 %1046 }
 0x409   :  { %v910_v30 = vmul.f32 %v1497_v27, %v1899_v58  ;;  %1506 = vlog2.f32 %v1047_v29 }
 0x40a   :  { %v907_v31 = vsub.f32 %v1888_v48, %v904_v28  ;;  %1508 = vrcp.f32 %v1047_v29 }
 0x40b   :  { %v1499_v32 = vpop.eup %1498  ;;  %915 = vst [vmem:[%s1988_s10 + $0x10] sm:$0xff] %v910_v30  ;;  %v917_v36 = vadd.f32 %v910_v30, %v772_v33 }
 0x40c   :  { %v1501_v34 = vpop.eup %1500  ;;  %913 = vst [vmem:[%s1989_s9 + $0x10] sm:$0xff] %v907_v31  ;;  %v1049_v35 = vmul.f32 0.6931472, %v1499_v32 }
 0x40d   :  { %v1055_v37 = vmul.f32 %v1501_v34, %v1903_v60 }
 0x40e   :  { %v1052_v38 = vsub.f32 %v1891_v51, %v1049_v35 }
 0x40f   :  { %v1503_v39 = vpop.eup %1502  ;;  %1060 = vst [vmem:[%s1988_s10 + $0x18] sm:$0xff] %v1055_v37  ;;  %v1062_v40 = vadd.f32 %v1055_v37, %v917_v36 }
 0x410   :  { %v1505_v41 = vpop.eup %1504  ;;  %1058 = vst [vmem:[%s1989_s9 + $0x18] sm:$0xff] %v1052_v38  ;;  %v906_v42 = vmul.f32 0.6931472, %v1503_v39 }
 0x411   :  { %1510 = vlog2.f32 %v1062_v40  ;;  %v912_v43 = vmul.f32 %v1505_v41, %v1906_v61 }
 0x412   :  { %v908_v44 = vsub.f32 %v1894_v54, %v906_v42 }
 0x413   :  { %v1507_v45 = vpop.eup %1506  ;;  %916 = vst [vmem:[%s1988_s10 + $0x30] sm:$0xff] %v912_v43  ;;  %v918_v49 = vadd.f32 %v912_v43, %v773_v46 }
 0x414   :  { %v1509_v47 = vpop.eup %1508  ;;  %914 = vst [vmem:[%s1989_s9 + $0x30] sm:$0xff] %v908_v44  ;;  %v1051_v48 = vmul.f32 0.6931472, %v1507_v45 }
 0x415   :  { %v1057_v50 = vmul.f32 %v1509_v47, %v1909_v62 }
 0x416   :  { %v1053_v51 = vsub.f32 %v1897_v57, %v1051_v48 }
 0x417   :  { %1061 = vst [vmem:[%s1988_s10 + $0x38] sm:$0xff] %v1057_v50  ;;  %v1063_v52 = vadd.f32 %v1057_v50, %v918_v49 }
 0x418   :  { %1059 = vst [vmem:[%s1989_s9 + $0x38] sm:$0xff] %v1053_v51 }
 0x419   :  { %1512 = vlog2.f32 %v1063_v52 }
 0x41b   :  { %v1511_v53 = vpop.eup %1510 }
 0x41c   :  { %v1065_v54 = vmul.f32 0.6931472, %v1511_v53 }
 0x41e   :  { %1068 = vst [vmem:[%s1990_s11] sm:$0xff] %v1065_v54 }
 0x423   :  { %v1513_v55 = vpop.eup %1512 }
 0x424   :  { %v1067_v56 = vmul.f32 0.6931472, %v1513_v55 }
 0x426   :  { %1069 = vst [vmem:[%s1990_s11 + $0x8] sm:$0xff] %v1067_v56 }

</bundles_post_ra>
